<compile_context>
chip_gen: v7x
topology: tpu7x:2x2x1
jax: 0.10.0
libtpu: 0.0.40
codegen_flags: <defaults>
</compile_context>

<pallas_src>
import math
import functools

import jax
import jax.numpy as jnp
from jax.experimental import pallas as pl
from jax.experimental.pallas import tpu as pltpu


# Tile targets: 256-aligned for v6e/v7x (2x256 MXU), multiples of 128 for v5e.
TM, TN, TK = 256, 256, 512
TQ = 256   # attention q / kv tile


def _pick_tile(dim, target):
    """Largest tile <= target that evenly divides dim (full dim if it fits)."""
    if dim <= target:
        return dim
    for t in range(target, 0, -1):
        if dim % t == 0:
            return t
    return dim


# ----------------------------------------------------------------------------
# Pallas kernels
# ----------------------------------------------------------------------------

def _matmul_kernel(x_ref, w_ref, o_ref, acc_ref):
    # bf16 x bf16 -> f32 accumulation on the MXU; K is the innermost grid axis.
    @pl.when(pl.program_id(2) == 0)
    def _():
        acc_ref[...] = jnp.zeros_like(acc_ref)

    acc_ref[...] += jnp.dot(x_ref[...], w_ref[...],
                            preferred_element_type=jnp.float32)

    @pl.when(pl.program_id(2) == pl.num_programs(2) - 1)
    def _():
        o_ref[...] = acc_ref[...].astype(o_ref.dtype)


def _matmul_add_kernel(x_ref, w_ref, r_ref, o_ref, acc_ref):
    # Same as _matmul_kernel with the residual add fused into the epilogue.
    @pl.when(pl.program_id(2) == 0)
    def _():
        acc_ref[...] = jnp.zeros_like(acc_ref)

    acc_ref[...] += jnp.dot(x_ref[...], w_ref[...],
                            preferred_element_type=jnp.float32)

    @pl.when(pl.program_id(2) == pl.num_programs(2) - 1)
    def _():
        o_ref[...] = (acc_ref[...]
                      + r_ref[...].astype(jnp.float32)).astype(o_ref.dtype)


def _fc_swiglu_kernel(x_ref, wa_ref, wb_ref, o_ref, acc_a, acc_b):
    # Fused c_fc (both halves) + SwiGLU gate: silu(x@Wa) * (x@Wb).
    k = pl.program_id(2)

    @pl.when(k == 0)
    def _():
        acc_a[...] = jnp.zeros_like(acc_a)
        acc_b[...] = jnp.zeros_like(acc_b)

    acc_a[...] += jnp.dot(x_ref[...], wa_ref[...],
                          preferred_element_type=jnp.float32)
    acc_b[...] += jnp.dot(x_ref[...], wb_ref[...],
                          preferred_element_type=jnp.float32)

    @pl.when(k == pl.num_programs(2) - 1)
    def _():
        a = acc_a[...]                              # epilogue math in f32 vregs
        o_ref[...] = (a * jax.nn.sigmoid(a) * acc_b[...]).astype(o_ref.dtype)


def _rmsnorm_kernel(x_ref, w_ref, o_ref):
    x = x_ref[...].astype(jnp.float32)
    ms = jnp.mean(x * x, axis=-1, keepdims=True)
    y = x * jax.lax.rsqrt(ms + 1e-8)
    o_ref[...] = (y * w_ref[...].astype(jnp.float32)).astype(o_ref.dtype)


def _flash_attn_kernel(q_ref, k_ref, v_ref, o_ref, m_sc, l_sc, acc_sc,
                       *, scale, tq, tkv):
    qi = pl.program_id(1)
    ki = pl.program_id(2)

    @pl.when(ki == 0)
    def _():
        m_sc[...] = jnp.full_like(m_sc, -jnp.inf)
        l_sc[...] = jnp.zeros_like(l_sc)
        acc_sc[...] = jnp.zeros_like(acc_sc)

    # Causal skip: kv tiles strictly above the diagonal contribute nothing
    # (tq == tkv, so tile (qi, ki) has unmasked entries iff ki <= qi).
    @pl.when(ki <= qi)
    def _():
        q = q_ref[0]                                # (tq, Dh) bf16
        k = k_ref[0]                                # (tkv, Dh) bf16
        s = jax.lax.dot_general(q, k, (((1,), (1,)), ((), ())),
                                preferred_element_type=jnp.float32) * scale
        row = qi * tq + jax.lax.broadcasted_iota(jnp.int32, (tq, tkv), 0)
        col = ki * tkv + jax.lax.broadcasted_iota(jnp.int32, (tq, tkv), 1)
        s = jnp.where(col <= row, s, -1e30)

        m_prev = m_sc[...]
        m_new = jnp.maximum(m_prev, jnp.max(s, axis=-1, keepdims=True))
        alpha = jnp.exp(m_prev - m_new)
        p = jnp.exp(s - m_new)
        l_sc[...] = alpha * l_sc[...] + jnp.sum(p, axis=-1, keepdims=True)
        acc_sc[...] = alpha * acc_sc[...] + jnp.dot(
            p.astype(v_ref.dtype), v_ref[0], preferred_element_type=jnp.float32)
        m_sc[...] = m_new

    @pl.when(ki == pl.num_programs(2) - 1)
    def _():
        inv_l = pl.reciprocal(l_sc[...], approx=True)
        o_ref[0] = (acc_sc[...] * inv_l).astype(o_ref.dtype)


# ----------------------------------------------------------------------------
# Pallas wrappers
# ----------------------------------------------------------------------------

def linear(x2d, w_kn, out_dtype=jnp.bfloat16, residual=None,
           tm=TM, tn=TN, tk=TK):
    """y = x2d @ w_kn (+ residual). w_kn is pre-transposed (in, out), bf16."""
    m, k = x2d.shape
    kw, n = w_kn.shape
    assert k == kw
    tm = _pick_tile(m, tm)
    tn = _pick_tile(n, tn)
    tk = _pick_tile(k, tk)
    grid = (m // tm, n // tn, k // tk)

    x_spec = pl.BlockSpec((tm, tk), lambda i, j, kk: (i, kk))
    w_spec = pl.BlockSpec((tk, tn), lambda i, j, kk: (kk, j))
    o_spec = pl.BlockSpec((tm, tn), lambda i, j, kk: (i, j))
    params = pltpu.CompilerParams(
        dimension_semantics=("parallel", "parallel", "arbitrary"))
    scratch = [pltpu.VMEM((tm, tn), jnp.float32)]

    if residual is None:
        return pl.pallas_call(
            _matmul_kernel,
            out_shape=jax.ShapeDtypeStruct((m, n), out_dtype),
            grid=grid,
            in_specs=[x_spec, w_spec],
            out_specs=o_spec,
            scratch_shapes=scratch,
            compiler_params=params,
        )(x2d, w_kn)

    r_spec = pl.BlockSpec((tm, tn), lambda i, j, kk: (i, j))
    return pl.pallas_call(
        _matmul_add_kernel,
        out_shape=jax.ShapeDtypeStruct((m, n), out_dtype),
        grid=grid,
        in_specs=[x_spec, w_spec, r_spec],
        out_specs=o_spec,
        scratch_shapes=scratch,
        compiler_params=params,
    )(x2d, w_kn, residual)


def fc_swiglu(x2d, wa_kn, wb_kn, out_dtype=jnp.bfloat16, tm=TM, tn=TN, tk=TK):
    """silu(x @ Wa) * (x @ Wb) without materializing the (M, 8C) activation."""
    m, k = x2d.shape
    _, n = wa_kn.shape
    tm = _pick_tile(m, tm)
    tn = _pick_tile(n, tn)
    tk = _pick_tile(k, tk)
    grid = (m // tm, n // tn, k // tk)
    return pl.pallas_call(
        _fc_swiglu_kernel,
        out_shape=jax.ShapeDtypeStruct((m, n), out_dtype),
        grid=grid,
        in_specs=[pl.BlockSpec((tm, tk), lambda i, j, kk: (i, kk)),
                  pl.BlockSpec((tk, tn), lambda i, j, kk: (kk, j)),
                  pl.BlockSpec((tk, tn), lambda i, j, kk: (kk, j))],
        out_specs=pl.BlockSpec((tm, tn), lambda i, j, kk: (i, j)),
        scratch_shapes=[pltpu.VMEM((tm, tn), jnp.float32),
                        pltpu.VMEM((tm, tn), jnp.float32)],
        compiler_params=pltpu.CompilerParams(
            dimension_semantics=("parallel", "parallel", "arbitrary")),
    )(x2d, wa_kn, wb_kn)


def rmsnorm(x2d, w_row, tm=TM):
    m, c = x2d.shape
    tm = _pick_tile(m, tm)
    return pl.pallas_call(
        _rmsnorm_kernel,
        out_shape=jax.ShapeDtypeStruct((m, c), x2d.dtype),
        grid=(m // tm,),
        in_specs=[pl.BlockSpec((tm, c), lambda i: (i, 0)),
                  pl.BlockSpec((1, c), lambda i: (0, 0))],
        out_specs=pl.BlockSpec((tm, c), lambda i: (i, 0)),
        compiler_params=pltpu.CompilerParams(dimension_semantics=("parallel",)),
    )(x2d, w_row)


def flash_attention(q, k, v, tq=TQ):
    """q, k, v: (B*H, T, Dh) bf16. Causal flash attention -> (B*H, T, Dh)."""
    bh, t, dh = q.shape
    tq = _pick_tile(t, tq)
    tkv = tq
    grid = (bh, t // tq, t // tkv)
    scale = 1.0 / math.sqrt(dh)
    kernel = functools.partial(_flash_attn_kernel, scale=scale, tq=tq, tkv=tkv)

    q_spec = pl.BlockSpec((1, tq, dh), lambda b, qi, ki: (b, qi, 0))
    # Clamp the kv block index so fully-masked tiles (ki > qi) do not trigger
    # new DMA traffic (block index unchanged -> Pallas skips the fetch).
    kv_spec = pl.BlockSpec((1, tkv, dh),
                           lambda b, qi, ki: (b, jnp.minimum(ki, qi), 0))

    return pl.pallas_call(
        kernel,
        out_shape=jax.ShapeDtypeStruct((bh, t, dh), q.dtype),
        grid=grid,
        in_specs=[q_spec, kv_spec, kv_spec],
        out_specs=pl.BlockSpec((1, tq, dh), lambda b, qi, ki: (b, qi, 0)),
        scratch_shapes=[pltpu.VMEM((tq, 1), jnp.float32),
                        pltpu.VMEM((tq, 1), jnp.float32),
                        pltpu.VMEM((tq, dh), jnp.float32)],
        compiler_params=pltpu.CompilerParams(
            dimension_semantics=("parallel", "parallel", "arbitrary")),
    )(q, k, v)


# ----------------------------------------------------------------------------
# Model (glue in plain JAX, hot paths in Pallas)
# ----------------------------------------------------------------------------

def block_forward(x2d, p, n_head, b, t):
    # out = x + attn(ln1(x)) + mlp(ln2(x)); residual stream kept bf16 (M, C).
    c = x2d.shape[-1]
    h = n_head
    dh = c // h

    # --- attention branch ---
    h1 = rmsnorm(x2d, p["ln1_w"])                       # bf16 (M, C)
    qkv = linear(h1, p["attn_c_attn_w"])                # bf16 (M, 3C)
    q, k_, v = jnp.split(qkv, 3, axis=-1)

    # TODO(synk): head split/merge is XLA transpose glue; folding it into the
    #             attention BlockSpec needs 128-aligned per-head column tiles.
    def to_heads(tns):
        return (tns.reshape(b, t, h, dh)
                   .transpose(0, 2, 1, 3)
                   .reshape(b * h, t, dh))

    y = flash_attention(to_heads(q), to_heads(k_), to_heads(v))    # bf16
    y = y.reshape(b, h, t, dh).transpose(0, 2, 1, 3).reshape(b * t, c)
    x_attn = linear(y, p["attn_c_proj_w"], residual=x2d)            # x + attn

    # --- MLP branch (SwiGLU), ln2 applied to the original x ---
    h2 = rmsnorm(x2d, p["ln2_w"])                                   # bf16
    g = fc_swiglu(h2, p["mlp_c_fc_a_w"], p["mlp_c_fc_b_w"])         # bf16 (M, 4C)
    out = linear(g, p["mlp_c_proj_w"], residual=x_attn)             # + mlp
    return out


def gpt_forward(idx, params, n_head):
    # embedding lookup (gather) kept as glue
    b, t = idx.shape
    x = jnp.take(params["wte"], idx, axis=0).astype(jnp.bfloat16)   # (B, T, C)
    c = x.shape[-1]
    x2d = x.reshape(b * t, c)
    for bp in params["blocks"]:
        x2d = block_forward(x2d, bp, n_head, b, t)
    xf = rmsnorm(x2d, params["ln_f_w"])
    logits = linear(xf, params["lm_head_w"], out_dtype=jnp.float32)  # (M, V)
    return logits.reshape(b, t, -1)
    # TODO(synk): cross-entropy loss path unused (targets=None in reference call)


# ----------------------------------------------------------------------------
# Deterministic parameter init (mirrors GPT._init_weights); weights stored
# pre-transposed (in, out) in bf16 so no per-call transpose is needed.
# ----------------------------------------------------------------------------

def init_params(key, vocab_size, n_layer, n_head, n_embd):
    c = n_embd
    std = 0.02
    std_proj = 0.02 * (2 * n_layer) ** -0.5    # NANOGPT_SCALE_INIT layers
    keys = jax.random.split(key, 2 + n_layer)

    def w(k, out_f, in_f, s):
        # torch Linear-style (out, in) init, stored as (in, out) bf16
        return (jax.random.normal(k, (out_f, in_f), jnp.float32) * s).T.astype(
            jnp.bfloat16)

    params = {
        "wte": jax.random.normal(keys[0], (vocab_size, c), jnp.float32) * std,
        "ln_f_w": jnp.ones((1, c), jnp.float32),
        "lm_head_w": w(keys[1], vocab_size, c, std_proj),            # (C, V)
        "blocks": [],
    }
    for l in range(n_layer):
        k = jax.random.split(keys[2 + l], 4)
        fc_w = w(k[2], 8 * c, c, std)                                # (C, 8C)
        params["blocks"].append(dict(
            ln1_w=jnp.ones((1, c), jnp.float32),
            ln2_w=jnp.ones((1, c), jnp.float32),
            attn_c_attn_w=w(k[0], 3 * c, c, std),                    # (C, 3C)
            attn_c_proj_w=w(k[1], c, c, std_proj),                   # (C, C)
            mlp_c_fc_a_w=fc_w[:, :4 * c],                            # gate half
            mlp_c_fc_b_w=fc_w[:, 4 * c:],                            # value half
            mlp_c_proj_w=w(k[3], c, 4 * c, std_proj),                # (4C, C)
        ))
    return params


# ----------------------------------------------------------------------------
# Main
# ----------------------------------------------------------------------------

if __name__ == "__main__":
    # Small config consistent with GPTConfig (n_embd divisible by n_head).
    B, T = 2, 8
    VOCAB, N_LAYER, N_HEAD, N_EMBD = 256, 2, 4, 32

    key = jax.random.PRNGKey(0)
    pkey, ikey = jax.random.split(key)
    params = init_params(pkey, VOCAB, N_LAYER, N_HEAD, N_EMBD)
    idx = jax.random.randint(ikey, (B, T), 0, VOCAB, dtype=jnp.int32)

    fwd = jax.jit(functools.partial(gpt_forward, n_head=N_HEAD))
    logits = fwd(idx, params)
    jax.block_until_ready(logits)

    assert logits.shape == (B, T, VOCAB), logits.shape
    assert logits.dtype == jnp.float32, logits.dtype
    print("KERNEL_OK")
</pallas_src>

<mosaic_0001>
module attributes {stable_mosaic.version = 11 : i64} {
  func.func @_rmsnorm_kernel(%arg0: i32, %arg1: memref<16x32xbf16, #tpu.memory_space<vmem>>, %arg2: memref<1x32xf32, #tpu.memory_space<vmem>>, %arg3: memref<16x32xbf16, #tpu.memory_space<vmem>>) attributes {dimension_semantics = [#tpu.dimension_semantics<parallel>], iteration_bounds = array<i64: 1>, scalar_prefetch = 0 : i64, scratch_operands = 0 : i64, tpu.core_type = #tpu.core_type<tc>, window_params = [{transform_indices = @transform_0, window_bounds = array<i64: 16, 32>}, {pipeline_mode = #tpu.pipeline_mode<synchronous>, transform_indices = @transform_1, window_bounds = array<i64: 1, 32>}, {transform_indices = @transform_2, window_bounds = array<i64: 16, 32>}]} {
    %c0 = arith.constant 0 : index
    %c0_0 = arith.constant 0 : index
    %0 = vector.load %arg1[%c0, %c0_0] : memref<16x32xbf16, #tpu.memory_space<vmem>>, vector<16x32xbf16>
    %1 = arith.extf %0 : vector<16x32xbf16> to vector<16x32xf32>
    %2 = arith.mulf %1, %1 : vector<16x32xf32>
    %cst = arith.constant dense<0.000000e+00> : vector<16xf32>
    %3 = vector.multi_reduction <add>, %2, %cst [1] : vector<16x32xf32> to vector<16xf32>
    %4 = vector.shape_cast %3 : vector<16xf32> to vector<16x1xf32>
    %cst_1 = arith.constant 3.200000e+01 : f32
    %5 = vector.broadcast %cst_1 : f32 to vector<16x1xf32>
    %6 = arith.divf %4, %5 : vector<16x1xf32>
    %cst_2 = arith.constant 9.99999993E-9 : f32
    %7 = vector.broadcast %cst_2 : f32 to vector<16x1xf32>
    %8 = arith.addf %6, %7 : vector<16x1xf32>
    %9 = math.rsqrt %8 : vector<16x1xf32>
    %10 = vector.broadcast %9 : vector<16x1xf32> to vector<16x32xf32>
    %11 = arith.mulf %1, %10 : vector<16x32xf32>
    %c0_3 = arith.constant 0 : index
    %c0_4 = arith.constant 0 : index
    %12 = vector.load %arg2[%c0_3, %c0_4] : memref<1x32xf32, #tpu.memory_space<vmem>>, vector<1x32xf32>
    %13 = vector.broadcast %12 : vector<1x32xf32> to vector<16x32xf32>
    %14 = arith.mulf %11, %13 : vector<16x32xf32>
    %15 = arith.truncf %14 : vector<16x32xf32> to vector<16x32xbf16>
    %c0_5 = arith.constant 0 : index
    %c0_6 = arith.constant 0 : index
    %16 = vector.load %arg3[%c0_5, %c0_6] : memref<16x32xbf16, #tpu.memory_space<vmem>>, vector<16x32xbf16>
    tpu.vector_store %arg3[%c0_5, %c0_6], %15 {strides = array<i32>} : memref<16x32xbf16, #tpu.memory_space<vmem>>, vector<16x32xbf16>,
    return
  }
  func.func @transform_0(%arg0: i32) -> (i32, i32) {
    %c0_i32 = arith.constant 0 : i32
    %c0_i32_0 = arith.constant 0 : i32
    return %arg0, %c0_i32 : i32, i32
  }
  func.func @transform_1(%arg0: i32) -> (i32, i32) {
    %c0_i32 = arith.constant 0 : i32
    %c0_i32_0 = arith.constant 0 : i32
    %c0_i32_1 = arith.constant 0 : i32
    return %c0_i32, %c0_i32_0 : i32, i32
  }
  func.func @transform_2(%arg0: i32) -> (i32, i32) {
    %c0_i32 = arith.constant 0 : i32
    %c0_i32_0 = arith.constant 0 : i32
    return %arg0, %c0_i32 : i32, i32
  }
}

module attributes {stable_mosaic.version = 11 : i64} {
  func.func @_matmul_kernel(%arg0: i32, %arg1: i32, %arg2: i32, %arg3: memref<16x32xbf16, #tpu.memory_space<vmem>>, %arg4: memref<32x96xbf16, #tpu.memory_space<vmem>>, %arg5: memref<16x96xbf16, #tpu.memory_space<vmem>>, %arg6: memref<16x96xf32, #tpu.memory_space<vmem>>) attributes {dimension_semantics = [#tpu.dimension_semantics<parallel>, #tpu.dimension_semantics<parallel>, #tpu.dimension_semantics<arbitrary>], iteration_bounds = array<i64: 1, 1, 1>, scalar_prefetch = 0 : i64, scratch_operands = 1 : i64, tpu.core_type = #tpu.core_type<tc>, window_params = [{transform_indices = @transform_0, window_bounds = array<i64: 16, 32>}, {transform_indices = @transform_1, window_bounds = array<i64: 32, 96>}, {transform_indices = @transform_2, window_bounds = array<i64: 16, 96>}]} {
    %c0_i32 = arith.constant 0 : i32
    %0 = arith.cmpi eq, %arg2, %c0_i32 : i32
    %1 = arith.extui %0 : i1 to i32
    %c0_i32_0 = arith.constant 0 : i32
    %2 = arith.cmpi ne, %1, %c0_i32_0 : i32
    scf.if %2 {
      %cst_10 = arith.constant 0.000000e+00 : f32
      %12 = vector.broadcast %cst_10 : f32 to vector<16x96xf32>
      %c0_11 = arith.constant 0 : index
      %c0_12 = arith.constant 0 : index
      %13 = vector.load %arg6[%c0_11, %c0_12] : memref<16x96xf32, #tpu.memory_space<vmem>>, vector<16x96xf32>
      tpu.vector_store %arg6[%c0_11, %c0_12], %12 {strides = array<i32>} : memref<16x96xf32, #tpu.memory_space<vmem>>, vector<16x96xf32>,
    } else {
    }
    %c0 = arith.constant 0 : index
    %c0_1 = arith.constant 0 : index
    %3 = vector.load %arg6[%c0, %c0_1] : memref<16x96xf32, #tpu.memory_space<vmem>>, vector<16x96xf32>
    %c0_2 = arith.constant 0 : index
    %c0_3 = arith.constant 0 : index
    %4 = vector.load %arg3[%c0_2, %c0_3] : memref<16x32xbf16, #tpu.memory_space<vmem>>, vector<16x32xbf16>
    %c0_4 = arith.constant 0 : index
    %c0_5 = arith.constant 0 : index
    %5 = vector.load %arg4[%c0_4, %c0_5] : memref<32x96xbf16, #tpu.memory_space<vmem>>, vector<32x96xbf16>
    %cst = arith.constant dense<0.000000e+00> : vector<16x96xf32>
    %6 = tpu.matmul %4, %5, %cst {dimension_numbers = #tpu.dot_dimension_numbers<[1], [0], [0], [1], [0, 0, 1, 1], [], []>} : vector<16x32xbf16>, vector<32x96xbf16>, vector<16x96xf32> -> vector<16x96xf32>
    %7 = arith.addf %3, %6 : vector<16x96xf32>
    %c0_6 = arith.constant 0 : index
    %c0_7 = arith.constant 0 : index
    %8 = vector.load %arg6[%c0_6, %c0_7] : memref<16x96xf32, #tpu.memory_space<vmem>>, vector<16x96xf32>
    tpu.vector_store %arg6[%c0_6, %c0_7], %7 {strides = array<i32>} : memref<16x96xf32, #tpu.memory_space<vmem>>, vector<16x96xf32>,
    %c0_i32_8 = arith.constant 0 : i32
    %9 = arith.cmpi eq, %arg2, %c0_i32_8 : i32
    %10 = arith.extui %9 : i1 to i32
    %c0_i32_9 = arith.constant 0 : i32
    %11 = arith.cmpi ne, %10, %c0_i32_9 : i32
    scf.if %11 {
      %c0_10 = arith.constant 0 : index
      %c0_11 = arith.constant 0 : index
      %12 = vector.load %arg6[%c0_10, %c0_11] : memref<16x96xf32, #tpu.memory_space<vmem>>, vector<16x96xf32>
      %13 = arith.truncf %12 : vector<16x96xf32> to vector<16x96xbf16>
      %c0_12 = arith.constant 0 : index
      %c0_13 = arith.constant 0 : index
      %14 = vector.load %arg5[%c0_12, %c0_13] : memref<16x96xbf16, #tpu.memory_space<vmem>>, vector<16x96xbf16>
      tpu.vector_store %arg5[%c0_12, %c0_13], %13 {strides = array<i32>} : memref<16x96xbf16, #tpu.memory_space<vmem>>, vector<16x96xbf16>,
    } else {
    }
    return
  }
  func.func @transform_0(%arg0: i32, %arg1: i32, %arg2: i32) -> (i32, i32) {
    %c0_i32 = arith.constant 0 : i32
    return %arg0, %arg2 : i32, i32
  }
  func.func @transform_1(%arg0: i32, %arg1: i32, %arg2: i32) -> (i32, i32) {
    %c0_i32 = arith.constant 0 : i32
    return %arg2, %arg1 : i32, i32
  }
  func.func @transform_2(%arg0: i32, %arg1: i32, %arg2: i32) -> (i32, i32) {
    %c0_i32 = arith.constant 0 : i32
    return %arg0, %arg1 : i32, i32
  }
}

module attributes {stable_mosaic.version = 11 : i64} {
  func.func @_flash_attn_kernel(%arg0: i32, %arg1: i32, %arg2: i32, %arg3: memref<1x8x8xbf16, #tpu.memory_space<vmem>>, %arg4: memref<1x8x8xbf16, #tpu.memory_space<vmem>>, %arg5: memref<1x8x8xbf16, #tpu.memory_space<vmem>>, %arg6: memref<1x8x8xbf16, #tpu.memory_space<vmem>>, %arg7: memref<8x1xf32, #tpu.memory_space<vmem>>, %arg8: memref<8x1xf32, #tpu.memory_space<vmem>>, %arg9: memref<8x8xf32, #tpu.memory_space<vmem>>) attributes {dimension_semantics = [#tpu.dimension_semantics<parallel>, #tpu.dimension_semantics<parallel>, #tpu.dimension_semantics<arbitrary>], iteration_bounds = array<i64: 8, 1, 1>, scalar_prefetch = 0 : i64, scratch_operands = 3 : i64, tpu.core_type = #tpu.core_type<tc>, window_params = [{transform_indices = @transform_0, window_bounds = array<i64: 1, 8, 8>}, {transform_indices = @transform_1, window_bounds = array<i64: 1, 8, 8>}, {transform_indices = @transform_2, window_bounds = array<i64: 1, 8, 8>}, {transform_indices = @transform_3, window_bounds = array<i64: 1, 8, 8>}]} {
    %c0_i32 = arith.constant 0 : i32
    %0 = arith.cmpi eq, %arg2, %c0_i32 : i32
    %1 = arith.extui %0 : i1 to i32
    %c0_i32_0 = arith.constant 0 : i32
    %2 = arith.cmpi ne, %1, %c0_i32_0 : i32
    scf.if %2 {
      %cst = arith.constant 0xFF800000 : f32
      %9 = vector.broadcast %cst : f32 to vector<8x1xf32>
      %c0 = arith.constant 0 : index
      %c0_4 = arith.constant 0 : index
      %10 = vector.load %arg7[%c0, %c0_4] : memref<8x1xf32, #tpu.memory_space<vmem>>, vector<8x1xf32>
      tpu.vector_store %arg7[%c0, %c0_4], %9 {strides = array<i32>} : memref<8x1xf32, #tpu.memory_space<vmem>>, vector<8x1xf32>,
      %cst_5 = arith.constant 0.000000e+00 : f32
      %11 = vector.broadcast %cst_5 : f32 to vector<8x1xf32>
      %c0_6 = arith.constant 0 : index
      %c0_7 = arith.constant 0 : index
      %12 = vector.load %arg8[%c0_6, %c0_7] : memref<8x1xf32, #tpu.memory_space<vmem>>, vector<8x1xf32>
      tpu.vector_store %arg8[%c0_6, %c0_7], %11 {strides = array<i32>} : memref<8x1xf32, #tpu.memory_space<vmem>>, vector<8x1xf32>,
      %cst_8 = arith.constant 0.000000e+00 : f32
      %13 = vector.broadcast %cst_8 : f32 to vector<8x8xf32>
      %c0_9 = arith.constant 0 : index
      %c0_10 = arith.constant 0 : index
      %14 = vector.load %arg9[%c0_9, %c0_10] : memref<8x8xf32, #tpu.memory_space<vmem>>, vector<8x8xf32>
      tpu.vector_store %arg9[%c0_9, %c0_10], %13 {strides = array<i32>} : memref<8x8xf32, #tpu.memory_space<vmem>>, vector<8x8xf32>,
    } else {
    }
    %3 = arith.cmpi sle, %arg2, %arg1 : i32
    %4 = arith.extui %3 : i1 to i32
    %c0_i32_1 = arith.constant 0 : i32
    %5 = arith.cmpi ne, %4, %c0_i32_1 : i32
    scf.if %5 {
      %c0 = arith.constant 0 : index
      %c0_4 = arith.constant 0 : index
      %c0_5 = arith.constant 0 : index
      %9 = vector.load %arg3[%c0, %c0_4, %c0_5] : memref<1x8x8xbf16, #tpu.memory_space<vmem>>, vector<1x8x8xbf16>
      %10 = vector.shape_cast %9 : vector<1x8x8xbf16> to vector<8x8xbf16>
      %c0_6 = arith.constant 0 : index
      %c0_7 = arith.constant 0 : index
      %c0_8 = arith.constant 0 : index
      %11 = vector.load %arg4[%c0_6, %c0_7, %c0_8] : memref<1x8x8xbf16, #tpu.memory_space<vmem>>, vector<1x8x8xbf16>
      %12 = vector.shape_cast %11 : vector<1x8x8xbf16> to vector<8x8xbf16>
      %cst = arith.constant dense<0.000000e+00> : vector<8x8xf32>
      %13 = tpu.matmul %10, %12, %cst {dimension_numbers = #tpu.dot_dimension_numbers<[1], [1], [0], [0], [0, 0, 1, 0], [], []>} : vector<8x8xbf16>, vector<8x8xbf16>, vector<8x8xf32> -> vector<8x8xf32>
      %cst_9 = arith.constant 0.353553385 : f32
      %14 = vector.broadcast %cst_9 : f32 to vector<8x8xf32>
      %15 = arith.mulf %13, %14 : vector<8x8xf32>
      %c8_i32 = arith.constant 8 : i32
      %16 = arith.muli %arg1, %c8_i32 : i32
      %17 = tpu.iota {dimensions = array<i32: 0>} : vector<8x8xi32>
      %18 = vector.broadcast %16 : i32 to vector<8x8xi32>
      %19 = arith.addi %18, %17 : vector<8x8xi32>
      %c8_i32_10 = arith.constant 8 : i32
      %20 = arith.muli %arg2, %c8_i32_10 : i32
      %21 = tpu.iota {dimensions = array<i32: 1>} : vector<8x8xi32>
      %22 = vector.broadcast %20 : i32 to vector<8x8xi32>
      %23 = arith.addi %22, %21 : vector<8x8xi32>
      %24 = arith.cmpi sle, %23, %19 : vector<8x8xi32>
      %cst_11 = arith.constant -1.000000e+30 : f32
      %25 = vector.broadcast %cst_11 : f32 to vector<8x8xf32>
      %26 = arith.select %24, %15, %25 : vector<8x8xi1>, vector<8x8xf32>
      %c0_12 = arith.constant 0 : index
      %c0_13 = arith.constant 0 : index
      %27 = vector.load %arg7[%c0_12, %c0_13] : memref<8x1xf32, #tpu.memory_space<vmem>>, vector<8x1xf32>
      %cst_14 = arith.constant dense<0xFF800000> : vector<8xf32>
      %28 = vector.multi_reduction <maximumf>, %26, %cst_14 [1] : vector<8x8xf32> to vector<8xf32>
      %29 = vector.shape_cast %28 : vector<8xf32> to vector<8x1xf32>
      %30 = arith.maximumf %27, %29 : vector<8x1xf32>
      %31 = arith.subf %27, %30 : vector<8x1xf32>
      %32 = math.exp %31 : vector<8x1xf32>
      %33 = vector.broadcast %30 : vector<8x1xf32> to vector<8x8xf32>
      %34 = arith.subf %26, %33 : vector<8x8xf32>
      %35 = math.exp %34 : vector<8x8xf32>
      %c0_15 = arith.constant 0 : index
      %c0_16 = arith.constant 0 : index
      %36 = vector.load %arg8[%c0_15, %c0_16] : memref<8x1xf32, #tpu.memory_space<vmem>>, vector<8x1xf32>
      %37 = arith.mulf %32, %36 : vector<8x1xf32>
      %cst_17 = arith.constant dense<0.000000e+00> : vector<8xf32>
      %38 = vector.multi_reduction <add>, %35, %cst_17 [1] : vector<8x8xf32> to vector<8xf32>
      %39 = vector.shape_cast %38 : vector<8xf32> to vector<8x1xf32>
      %40 = arith.addf %37, %39 : vector<8x1xf32>
      %c0_18 = arith.constant 0 : index
      %c0_19 = arith.constant 0 : index
      %41 = vector.load %arg8[%c0_18, %c0_19] : memref<8x1xf32, #tpu.memory_space<vmem>>, vector<8x1xf32>
      tpu.vector_store %arg8[%c0_18, %c0_19], %40 {strides = array<i32>} : memref<8x1xf32, #tpu.memory_space<vmem>>, vector<8x1xf32>,
      %c0_20 = arith.constant 0 : index
      %c0_21 = arith.constant 0 : index
      %42 = vector.load %arg9[%c0_20, %c0_21] : memref<8x8xf32, #tpu.memory_space<vmem>>, vector<8x8xf32>
      %43 = vector.broadcast %32 : vector<8x1xf32> to vector<8x8xf32>
      %44 = arith.mulf %43, %42 : vector<8x8xf32>
      %45 = arith.truncf %35 : vector<8x8xf32> to vector<8x8xbf16>
      %c0_22 = arith.constant 0 : index
      %c0_23 = arith.constant 0 : index
      %c0_24 = arith.constant 0 : index
      %46 = vector.load %arg5[%c0_22, %c0_23, %c0_24] : memref<1x8x8xbf16, #tpu.memory_space<vmem>>, vector<1x8x8xbf16>
      %47 = vector.shape_cast %46 : vector<1x8x8xbf16> to vector<8x8xbf16>
      %cst_25 = arith.constant dense<0.000000e+00> : vector<8x8xf32>
      %48 = tpu.matmul %45, %47, %cst_25 {dimension_numbers = #tpu.dot_dimension_numbers<[1], [0], [0], [1], [0, 0, 1, 1], [], []>} : vector<8x8xbf16>, vector<8x8xbf16>, vector<8x8xf32> -> vector<8x8xf32>
      %49 = arith.addf %44, %48 : vector<8x8xf32>
      %c0_26 = arith.constant 0 : index
      %c0_27 = arith.constant 0 : index
      %50 = vector.load %arg9[%c0_26, %c0_27] : memref<8x8xf32, #tpu.memory_space<vmem>>, vector<8x8xf32>
      tpu.vector_store %arg9[%c0_26, %c0_27], %49 {strides = array<i32>} : memref<8x8xf32, #tpu.memory_space<vmem>>, vector<8x8xf32>,
      %c0_28 = arith.constant 0 : index
      %c0_29 = arith.constant 0 : index
      %51 = vector.load %arg7[%c0_28, %c0_29] : memref<8x1xf32, #tpu.memory_space<vmem>>, vector<8x1xf32>
      tpu.vector_store %arg7[%c0_28, %c0_29], %30 {strides = array<i32>} : memref<8x1xf32, #tpu.memory_space<vmem>>, vector<8x1xf32>,
    } else {
    }
    %c0_i32_2 = arith.constant 0 : i32
    %6 = arith.cmpi eq, %arg2, %c0_i32_2 : i32
    %7 = arith.extui %6 : i1 to i32
    %c0_i32_3 = arith.constant 0 : i32
    %8 = arith.cmpi ne, %7, %c0_i32_3 : i32
    scf.if %8 {
      %c0 = arith.constant 0 : index
      %c0_4 = arith.constant 0 : index
      %9 = vector.load %arg8[%c0, %c0_4] : memref<8x1xf32, #tpu.memory_space<vmem>>, vector<8x1xf32>
      %10 = tpu.reciprocal %9 {approx = true} : vector<8x1xf32> -> vector<8x1xf32>
      %c0_5 = arith.constant 0 : index
      %c0_6 = arith.constant 0 : index
      %11 = vector.load %arg9[%c0_5, %c0_6] : memref<8x8xf32, #tpu.memory_space<vmem>>, vector<8x8xf32>
      %12 = vector.broadcast %10 : vector<8x1xf32> to vector<8x8xf32>
      %13 = arith.mulf %11, %12 : vector<8x8xf32>
      %14 = arith.truncf %13 : vector<8x8xf32> to vector<8x8xbf16>
      %c0_7 = arith.constant 0 : index
      %c0_8 = arith.constant 0 : index
      %c0_9 = arith.constant 0 : index
      %15 = vector.load %arg6[%c0_7, %c0_8, %c0_9] : memref<1x8x8xbf16, #tpu.memory_space<vmem>>, vector<1x8x8xbf16>
      %16 = vector.shape_cast %15 : vector<1x8x8xbf16> to vector<8x8xbf16>
      %17 = vector.shape_cast %14 : vector<8x8xbf16> to vector<1x8x8xbf16>
      tpu.vector_store %arg6[%c0_7, %c0_8, %c0_9], %17 {strides = array<i32>} : memref<1x8x8xbf16, #tpu.memory_space<vmem>>, vector<1x8x8xbf16>,
    } else {
    }
    return
  }
  func.func @transform_0(%arg0: i32, %arg1: i32, %arg2: i32) -> (i32, i32, i32) {
    %c0_i32 = arith.constant 0 : i32
    %c0_i32_0 = arith.constant 0 : i32
    return %arg0, %arg1, %c0_i32 : i32, i32, i32
  }
  func.func @transform_1(%arg0: i32, %arg1: i32, %arg2: i32) -> (i32, i32, i32) {
    %0 = arith.minsi %arg2, %arg1 : i32
    %c0_i32 = arith.constant 0 : i32
    %c0_i32_0 = arith.constant 0 : i32
    return %arg0, %0, %c0_i32 : i32, i32, i32
  }
  func.func @transform_2(%arg0: i32, %arg1: i32, %arg2: i32) -> (i32, i32, i32) {
    %0 = arith.minsi %arg2, %arg1 : i32
    %c0_i32 = arith.constant 0 : i32
    %c0_i32_0 = arith.constant 0 : i32
    return %arg0, %0, %c0_i32 : i32, i32, i32
  }
  func.func @transform_3(%arg0: i32, %arg1: i32, %arg2: i32) -> (i32, i32, i32) {
    %c0_i32 = arith.constant 0 : i32
    %c0_i32_0 = arith.constant 0 : i32
    return %arg0, %arg1, %c0_i32 : i32, i32, i32
  }
}

module attributes {stable_mosaic.version = 11 : i64} {
  func.func @_matmul_add_kernel(%arg0: i32, %arg1: i32, %arg2: i32, %arg3: memref<16x32xbf16, #tpu.memory_space<vmem>>, %arg4: memref<32x32xbf16, #tpu.memory_space<vmem>>, %arg5: memref<16x32xbf16, #tpu.memory_space<vmem>>, %arg6: memref<16x32xbf16, #tpu.memory_space<vmem>>, %arg7: memref<16x32xf32, #tpu.memory_space<vmem>>) attributes {dimension_semantics = [#tpu.dimension_semantics<parallel>, #tpu.dimension_semantics<parallel>, #tpu.dimension_semantics<arbitrary>], iteration_bounds = array<i64: 1, 1, 1>, scalar_prefetch = 0 : i64, scratch_operands = 1 : i64, tpu.core_type = #tpu.core_type<tc>, window_params = [{transform_indices = @transform_0, window_bounds = array<i64: 16, 32>}, {transform_indices = @transform_1, window_bounds = array<i64: 32, 32>}, {transform_indices = @transform_2, window_bounds = array<i64: 16, 32>}, {transform_indices = @transform_3, window_bounds = array<i64: 16, 32>}]} {
    %c0_i32 = arith.constant 0 : i32
    %0 = arith.cmpi eq, %arg2, %c0_i32 : i32
    %1 = arith.extui %0 : i1 to i32
    %c0_i32_0 = arith.constant 0 : i32
    %2 = arith.cmpi ne, %1, %c0_i32_0 : i32
    scf.if %2 {
      %cst_10 = arith.constant 0.000000e+00 : f32
      %12 = vector.broadcast %cst_10 : f32 to vector<16x32xf32>
      %c0_11 = arith.constant 0 : index
      %c0_12 = arith.constant 0 : index
      %13 = vector.load %arg7[%c0_11, %c0_12] : memref<16x32xf32, #tpu.memory_space<vmem>>, vector<16x32xf32>
      tpu.vector_store %arg7[%c0_11, %c0_12], %12 {strides = array<i32>} : memref<16x32xf32, #tpu.memory_space<vmem>>, vector<16x32xf32>,
    } else {
    }
    %c0 = arith.constant 0 : index
    %c0_1 = arith.constant 0 : index
    %3 = vector.load %arg7[%c0, %c0_1] : memref<16x32xf32, #tpu.memory_space<vmem>>, vector<16x32xf32>
    %c0_2 = arith.constant 0 : index
    %c0_3 = arith.constant 0 : index
    %4 = vector.load %arg3[%c0_2, %c0_3] : memref<16x32xbf16, #tpu.memory_space<vmem>>, vector<16x32xbf16>
    %c0_4 = arith.constant 0 : index
    %c0_5 = arith.constant 0 : index
    %5 = vector.load %arg4[%c0_4, %c0_5] : memref<32x32xbf16, #tpu.memory_space<vmem>>, vector<32x32xbf16>
    %cst = arith.constant dense<0.000000e+00> : vector<16x32xf32>
    %6 = tpu.matmul %4, %5, %cst {dimension_numbers = #tpu.dot_dimension_numbers<[1], [0], [0], [1], [0, 0, 1, 1], [], []>} : vector<16x32xbf16>, vector<32x32xbf16>, vector<16x32xf32> -> vector<16x32xf32>
    %7 = arith.addf %3, %6 : vector<16x32xf32>
    %c0_6 = arith.constant 0 : index
    %c0_7 = arith.constant 0 : index
    %8 = vector.load %arg7[%c0_6, %c0_7] : memref<16x32xf32, #tpu.memory_space<vmem>>, vector<16x32xf32>
    tpu.vector_store %arg7[%c0_6, %c0_7], %7 {strides = array<i32>} : memref<16x32xf32, #tpu.memory_space<vmem>>, vector<16x32xf32>,
    %c0_i32_8 = arith.constant 0 : i32
    %9 = arith.cmpi eq, %arg2, %c0_i32_8 : i32
    %10 = arith.extui %9 : i1 to i32
    %c0_i32_9 = arith.constant 0 : i32
    %11 = arith.cmpi ne, %10, %c0_i32_9 : i32
    scf.if %11 {
      %c0_10 = arith.constant 0 : index
      %c0_11 = arith.constant 0 : index
      %12 = vector.load %arg7[%c0_10, %c0_11] : memref<16x32xf32, #tpu.memory_space<vmem>>, vector<16x32xf32>
      %c0_12 = arith.constant 0 : index
      %c0_13 = arith.constant 0 : index
      %13 = vector.load %arg5[%c0_12, %c0_13] : memref<16x32xbf16, #tpu.memory_space<vmem>>, vector<16x32xbf16>
      %14 = arith.extf %13 : vector<16x32xbf16> to vector<16x32xf32>
      %15 = arith.addf %12, %14 : vector<16x32xf32>
      %16 = arith.truncf %15 : vector<16x32xf32> to vector<16x32xbf16>
      %c0_14 = arith.constant 0 : index
      %c0_15 = arith.constant 0 : index
      %17 = vector.load %arg6[%c0_14, %c0_15] : memref<16x32xbf16, #tpu.memory_space<vmem>>, vector<16x32xbf16>
      tpu.vector_store %arg6[%c0_14, %c0_15], %16 {strides = array<i32>} : memref<16x32xbf16, #tpu.memory_space<vmem>>, vector<16x32xbf16>,
    } else {
    }
    return
  }
  func.func @transform_0(%arg0: i32, %arg1: i32, %arg2: i32) -> (i32, i32) {
    %c0_i32 = arith.constant 0 : i32
    return %arg0, %arg2 : i32, i32
  }
  func.func @transform_1(%arg0: i32, %arg1: i32, %arg2: i32) -> (i32, i32) {
    %c0_i32 = arith.constant 0 : i32
    return %arg2, %arg1 : i32, i32
  }
  func.func @transform_2(%arg0: i32, %arg1: i32, %arg2: i32) -> (i32, i32) {
    %c0_i32 = arith.constant 0 : i32
    return %arg0, %arg1 : i32, i32
  }
  func.func @transform_3(%arg0: i32, %arg1: i32, %arg2: i32) -> (i32, i32) {
    %c0_i32 = arith.constant 0 : i32
    return %arg0, %arg1 : i32, i32
  }
}

module attributes {stable_mosaic.version = 11 : i64} {
  func.func @_fc_swiglu_kernel(%arg0: i32, %arg1: i32, %arg2: i32, %arg3: memref<16x32xbf16, #tpu.memory_space<vmem>>, %arg4: memref<32x128xbf16, #tpu.memory_space<vmem>>, %arg5: memref<32x128xbf16, #tpu.memory_space<vmem>>, %arg6: memref<16x128xbf16, #tpu.memory_space<vmem>>, %arg7: memref<16x128xf32, #tpu.memory_space<vmem>>, %arg8: memref<16x128xf32, #tpu.memory_space<vmem>>) attributes {dimension_semantics = [#tpu.dimension_semantics<parallel>, #tpu.dimension_semantics<parallel>, #tpu.dimension_semantics<arbitrary>], iteration_bounds = array<i64: 1, 1, 1>, scalar_prefetch = 0 : i64, scratch_operands = 2 : i64, tpu.core_type = #tpu.core_type<tc>, window_params = [{transform_indices = @transform_0, window_bounds = array<i64: 16, 32>}, {transform_indices = @transform_1, window_bounds = array<i64: 32, 128>}, {transform_indices = @transform_2, window_bounds = array<i64: 32, 128>}, {transform_indices = @transform_3, window_bounds = array<i64: 16, 128>}]} {
    %c0_i32 = arith.constant 0 : i32
    %0 = arith.cmpi eq, %arg2, %c0_i32 : i32
    %1 = arith.extui %0 : i1 to i32
    %c0_i32_0 = arith.constant 0 : i32
    %2 = arith.cmpi ne, %1, %c0_i32_0 : i32
    scf.if %2 {
      %cst_19 = arith.constant 0.000000e+00 : f32
      %18 = vector.broadcast %cst_19 : f32 to vector<16x128xf32>
      %c0_20 = arith.constant 0 : index
      %c0_21 = arith.constant 0 : index
      %19 = vector.load %arg7[%c0_20, %c0_21] : memref<16x128xf32, #tpu.memory_space<vmem>>, vector<16x128xf32>
      tpu.vector_store %arg7[%c0_20, %c0_21], %18 {strides = array<i32>} : memref<16x128xf32, #tpu.memory_space<vmem>>, vector<16x128xf32>,
      %cst_22 = arith.constant 0.000000e+00 : f32
      %20 = vector.broadcast %cst_22 : f32 to vector<16x128xf32>
      %c0_23 = arith.constant 0 : index
      %c0_24 = arith.constant 0 : index
      %21 = vector.load %arg8[%c0_23, %c0_24] : memref<16x128xf32, #tpu.memory_space<vmem>>, vector<16x128xf32>
      tpu.vector_store %arg8[%c0_23, %c0_24], %20 {strides = array<i32>} : memref<16x128xf32, #tpu.memory_space<vmem>>, vector<16x128xf32>,
    } else {
    }
    %c0 = arith.constant 0 : index
    %c0_1 = arith.constant 0 : index
    %3 = vector.load %arg7[%c0, %c0_1] : memref<16x128xf32, #tpu.memory_space<vmem>>, vector<16x128xf32>
    %c0_2 = arith.constant 0 : index
    %c0_3 = arith.constant 0 : index
    %4 = vector.load %arg3[%c0_2, %c0_3] : memref<16x32xbf16, #tpu.memory_space<vmem>>, vector<16x32xbf16>
    %c0_4 = arith.constant 0 : index
    %c0_5 = arith.constant 0 : index
    %5 = vector.load %arg4[%c0_4, %c0_5] : memref<32x128xbf16, #tpu.memory_space<vmem>>, vector<32x128xbf16>
    %cst = arith.constant dense<0.000000e+00> : vector<16x128xf32>
    %6 = tpu.matmul %4, %5, %cst {dimension_numbers = #tpu.dot_dimension_numbers<[1], [0], [0], [1], [0, 0, 1, 1], [], []>} : vector<16x32xbf16>, vector<32x128xbf16>, vector<16x128xf32> -> vector<16x128xf32>
    %7 = arith.addf %3, %6 : vector<16x128xf32>
    %c0_6 = arith.constant 0 : index
    %c0_7 = arith.constant 0 : index
    %8 = vector.load %arg7[%c0_6, %c0_7] : memref<16x128xf32, #tpu.memory_space<vmem>>, vector<16x128xf32>
    tpu.vector_store %arg7[%c0_6, %c0_7], %7 {strides = array<i32>} : memref<16x128xf32, #tpu.memory_space<vmem>>, vector<16x128xf32>,
    %c0_8 = arith.constant 0 : index
    %c0_9 = arith.constant 0 : index
    %9 = vector.load %arg8[%c0_8, %c0_9] : memref<16x128xf32, #tpu.memory_space<vmem>>, vector<16x128xf32>
    %c0_10 = arith.constant 0 : index
    %c0_11 = arith.constant 0 : index
    %10 = vector.load %arg3[%c0_10, %c0_11] : memref<16x32xbf16, #tpu.memory_space<vmem>>, vector<16x32xbf16>
    %c0_12 = arith.constant 0 : index
    %c0_13 = arith.constant 0 : index
    %11 = vector.load %arg5[%c0_12, %c0_13] : memref<32x128xbf16, #tpu.memory_space<vmem>>, vector<32x128xbf16>
    %cst_14 = arith.constant dense<0.000000e+00> : vector<16x128xf32>
    %12 = tpu.matmul %10, %11, %cst_14 {dimension_numbers = #tpu.dot_dimension_numbers<[1], [0], [0], [1], [0, 0, 1, 1], [], []>} : vector<16x32xbf16>, vector<32x128xbf16>, vector<16x128xf32> -> vector<16x128xf32>
    %13 = arith.addf %9, %12 : vector<16x128xf32>
    %c0_15 = arith.constant 0 : index
    %c0_16 = arith.constant 0 : index
    %14 = vector.load %arg8[%c0_15, %c0_16] : memref<16x128xf32, #tpu.memory_space<vmem>>, vector<16x128xf32>
    tpu.vector_store %arg8[%c0_15, %c0_16], %13 {strides = array<i32>} : memref<16x128xf32, #tpu.memory_space<vmem>>, vector<16x128xf32>,
    %c0_i32_17 = arith.constant 0 : i32
    %15 = arith.cmpi eq, %arg2, %c0_i32_17 : i32
    %16 = arith.extui %15 : i1 to i32
    %c0_i32_18 = arith.constant 0 : i32
    %17 = arith.cmpi ne, %16, %c0_i32_18 : i32
    scf.if %17 {
      %c0_19 = arith.constant 0 : index
      %c0_20 = arith.constant 0 : index
      %18 = vector.load %arg7[%c0_19, %c0_20] : memref<16x128xf32, #tpu.memory_space<vmem>>, vector<16x128xf32>
      %19 = arith.negf %18 : vector<16x128xf32>
      %20 = math.exp %19 : vector<16x128xf32>
      %cst_21 = arith.constant 1.000000e+00 : f32
      %21 = vector.broadcast %cst_21 : f32 to vector<16x128xf32>
      %22 = arith.addf %21, %20 : vector<16x128xf32>
      %23 = arith.divf %21, %22 : vector<16x128xf32>
      %24 = arith.mulf %18, %23 : vector<16x128xf32>
      %c0_22 = arith.constant 0 : index
      %c0_23 = arith.constant 0 : index
      %25 = vector.load %arg8[%c0_22, %c0_23] : memref<16x128xf32, #tpu.memory_space<vmem>>, vector<16x128xf32>
      %26 = arith.mulf %24, %25 : vector<16x128xf32>
      %27 = arith.truncf %26 : vector<16x128xf32> to vector<16x128xbf16>
      %c0_24 = arith.constant 0 : index
      %c0_25 = arith.constant 0 : index
      %28 = vector.load %arg6[%c0_24, %c0_25] : memref<16x128xbf16, #tpu.memory_space<vmem>>, vector<16x128xbf16>
      tpu.vector_store %arg6[%c0_24, %c0_25], %27 {strides = array<i32>} : memref<16x128xbf16, #tpu.memory_space<vmem>>, vector<16x128xbf16>,
    } else {
    }
    return
  }
  func.func @transform_0(%arg0: i32, %arg1: i32, %arg2: i32) -> (i32, i32) {
    %c0_i32 = arith.constant 0 : i32
    return %arg0, %arg2 : i32, i32
  }
  func.func @transform_1(%arg0: i32, %arg1: i32, %arg2: i32) -> (i32, i32) {
    %c0_i32 = arith.constant 0 : i32
    return %arg2, %arg1 : i32, i32
  }
  func.func @transform_2(%arg0: i32, %arg1: i32, %arg2: i32) -> (i32, i32) {
    %c0_i32 = arith.constant 0 : i32
    return %arg2, %arg1 : i32, i32
  }
  func.func @transform_3(%arg0: i32, %arg1: i32, %arg2: i32) -> (i32, i32) {
    %c0_i32 = arith.constant 0 : i32
    return %arg0, %arg1 : i32, i32
  }
}

module attributes {stable_mosaic.version = 11 : i64} {
  func.func @_matmul_add_kernel(%arg0: i32, %arg1: i32, %arg2: i32, %arg3: memref<16x128xbf16, #tpu.memory_space<vmem>>, %arg4: memref<128x32xbf16, #tpu.memory_space<vmem>>, %arg5: memref<16x32xbf16, #tpu.memory_space<vmem>>, %arg6: memref<16x32xbf16, #tpu.memory_space<vmem>>, %arg7: memref<16x32xf32, #tpu.memory_space<vmem>>) attributes {dimension_semantics = [#tpu.dimension_semantics<parallel>, #tpu.dimension_semantics<parallel>, #tpu.dimension_semantics<arbitrary>], iteration_bounds = array<i64: 1, 1, 1>, scalar_prefetch = 0 : i64, scratch_operands = 1 : i64, tpu.core_type = #tpu.core_type<tc>, window_params = [{transform_indices = @transform_0, window_bounds = array<i64: 16, 128>}, {transform_indices = @transform_1, window_bounds = array<i64: 128, 32>}, {transform_indices = @transform_2, window_bounds = array<i64: 16, 32>}, {transform_indices = @transform_3, window_bounds = array<i64: 16, 32>}]} {
    %c0_i32 = arith.constant 0 : i32
    %0 = arith.cmpi eq, %arg2, %c0_i32 : i32
    %1 = arith.extui %0 : i1 to i32
    %c0_i32_0 = arith.constant 0 : i32
    %2 = arith.cmpi ne, %1, %c0_i32_0 : i32
    scf.if %2 {
      %cst_10 = arith.constant 0.000000e+00 : f32
      %12 = vector.broadcast %cst_10 : f32 to vector<16x32xf32>
      %c0_11 = arith.constant 0 : index
      %c0_12 = arith.constant 0 : index
      %13 = vector.load %arg7[%c0_11, %c0_12] : memref<16x32xf32, #tpu.memory_space<vmem>>, vector<16x32xf32>
      tpu.vector_store %arg7[%c0_11, %c0_12], %12 {strides = array<i32>} : memref<16x32xf32, #tpu.memory_space<vmem>>, vector<16x32xf32>,
    } else {
    }
    %c0 = arith.constant 0 : index
    %c0_1 = arith.constant 0 : index
    %3 = vector.load %arg7[%c0, %c0_1] : memref<16x32xf32, #tpu.memory_space<vmem>>, vector<16x32xf32>
    %c0_2 = arith.constant 0 : index
    %c0_3 = arith.constant 0 : index
    %4 = vector.load %arg3[%c0_2, %c0_3] : memref<16x128xbf16, #tpu.memory_space<vmem>>, vector<16x128xbf16>
    %c0_4 = arith.constant 0 : index
    %c0_5 = arith.constant 0 : index
    %5 = vector.load %arg4[%c0_4, %c0_5] : memref<128x32xbf16, #tpu.memory_space<vmem>>, vector<128x32xbf16>
    %cst = arith.constant dense<0.000000e+00> : vector<16x32xf32>
    %6 = tpu.matmul %4, %5, %cst {dimension_numbers = #tpu.dot_dimension_numbers<[1], [0], [0], [1], [0, 0, 1, 1], [], []>} : vector<16x128xbf16>, vector<128x32xbf16>, vector<16x32xf32> -> vector<16x32xf32>
    %7 = arith.addf %3, %6 : vector<16x32xf32>
    %c0_6 = arith.constant 0 : index
    %c0_7 = arith.constant 0 : index
    %8 = vector.load %arg7[%c0_6, %c0_7] : memref<16x32xf32, #tpu.memory_space<vmem>>, vector<16x32xf32>
    tpu.vector_store %arg7[%c0_6, %c0_7], %7 {strides = array<i32>} : memref<16x32xf32, #tpu.memory_space<vmem>>, vector<16x32xf32>,
    %c0_i32_8 = arith.constant 0 : i32
    %9 = arith.cmpi eq, %arg2, %c0_i32_8 : i32
    %10 = arith.extui %9 : i1 to i32
    %c0_i32_9 = arith.constant 0 : i32
    %11 = arith.cmpi ne, %10, %c0_i32_9 : i32
    scf.if %11 {
      %c0_10 = arith.constant 0 : index
      %c0_11 = arith.constant 0 : index
      %12 = vector.load %arg7[%c0_10, %c0_11] : memref<16x32xf32, #tpu.memory_space<vmem>>, vector<16x32xf32>
      %c0_12 = arith.constant 0 : index
      %c0_13 = arith.constant 0 : index
      %13 = vector.load %arg5[%c0_12, %c0_13] : memref<16x32xbf16, #tpu.memory_space<vmem>>, vector<16x32xbf16>
      %14 = arith.extf %13 : vector<16x32xbf16> to vector<16x32xf32>
      %15 = arith.addf %12, %14 : vector<16x32xf32>
      %16 = arith.truncf %15 : vector<16x32xf32> to vector<16x32xbf16>
      %c0_14 = arith.constant 0 : index
      %c0_15 = arith.constant 0 : index
      %17 = vector.load %arg6[%c0_14, %c0_15] : memref<16x32xbf16, #tpu.memory_space<vmem>>, vector<16x32xbf16>
      tpu.vector_store %arg6[%c0_14, %c0_15], %16 {strides = array<i32>} : memref<16x32xbf16, #tpu.memory_space<vmem>>, vector<16x32xbf16>,
    } else {
    }
    return
  }
  func.func @transform_0(%arg0: i32, %arg1: i32, %arg2: i32) -> (i32, i32) {
    %c0_i32 = arith.constant 0 : i32
    return %arg0, %arg2 : i32, i32
  }
  func.func @transform_1(%arg0: i32, %arg1: i32, %arg2: i32) -> (i32, i32) {
    %c0_i32 = arith.constant 0 : i32
    return %arg2, %arg1 : i32, i32
  }
  func.func @transform_2(%arg0: i32, %arg1: i32, %arg2: i32) -> (i32, i32) {
    %c0_i32 = arith.constant 0 : i32
    return %arg0, %arg1 : i32, i32
  }
  func.func @transform_3(%arg0: i32, %arg1: i32, %arg2: i32) -> (i32, i32) {
    %c0_i32 = arith.constant 0 : i32
    return %arg0, %arg1 : i32, i32
  }
}

module attributes {stable_mosaic.version = 11 : i64} {
  func.func @_matmul_kernel(%arg0: i32, %arg1: i32, %arg2: i32, %arg3: memref<16x32xbf16, #tpu.memory_space<vmem>>, %arg4: memref<32x256xbf16, #tpu.memory_space<vmem>>, %arg5: memref<16x256xf32, #tpu.memory_space<vmem>>, %arg6: memref<16x256xf32, #tpu.memory_space<vmem>>) attributes {dimension_semantics = [#tpu.dimension_semantics<parallel>, #tpu.dimension_semantics<parallel>, #tpu.dimension_semantics<arbitrary>], iteration_bounds = array<i64: 1, 1, 1>, scalar_prefetch = 0 : i64, scratch_operands = 1 : i64, tpu.core_type = #tpu.core_type<tc>, window_params = [{transform_indices = @transform_0, window_bounds = array<i64: 16, 32>}, {transform_indices = @transform_1, window_bounds = array<i64: 32, 256>}, {transform_indices = @transform_2, window_bounds = array<i64: 16, 256>}]} {
    %c0_i32 = arith.constant 0 : i32
    %0 = arith.cmpi eq, %arg2, %c0_i32 : i32
    %1 = arith.extui %0 : i1 to i32
    %c0_i32_0 = arith.constant 0 : i32
    %2 = arith.cmpi ne, %1, %c0_i32_0 : i32
    scf.if %2 {
      %cst_10 = arith.constant 0.000000e+00 : f32
      %12 = vector.broadcast %cst_10 : f32 to vector<16x256xf32>
      %c0_11 = arith.constant 0 : index
      %c0_12 = arith.constant 0 : index
      %13 = vector.load %arg6[%c0_11, %c0_12] : memref<16x256xf32, #tpu.memory_space<vmem>>, vector<16x256xf32>
      tpu.vector_store %arg6[%c0_11, %c0_12], %12 {strides = array<i32>} : memref<16x256xf32, #tpu.memory_space<vmem>>, vector<16x256xf32>,
    } else {
    }
    %c0 = arith.constant 0 : index
    %c0_1 = arith.constant 0 : index
    %3 = vector.load %arg6[%c0, %c0_1] : memref<16x256xf32, #tpu.memory_space<vmem>>, vector<16x256xf32>
    %c0_2 = arith.constant 0 : index
    %c0_3 = arith.constant 0 : index
    %4 = vector.load %arg3[%c0_2, %c0_3] : memref<16x32xbf16, #tpu.memory_space<vmem>>, vector<16x32xbf16>
    %c0_4 = arith.constant 0 : index
    %c0_5 = arith.constant 0 : index
    %5 = vector.load %arg4[%c0_4, %c0_5] : memref<32x256xbf16, #tpu.memory_space<vmem>>, vector<32x256xbf16>
    %cst = arith.constant dense<0.000000e+00> : vector<16x256xf32>
    %6 = tpu.matmul %4, %5, %cst {dimension_numbers = #tpu.dot_dimension_numbers<[1], [0], [0], [1], [0, 0, 1, 1], [], []>} : vector<16x32xbf16>, vector<32x256xbf16>, vector<16x256xf32> -> vector<16x256xf32>
    %7 = arith.addf %3, %6 : vector<16x256xf32>
    %c0_6 = arith.constant 0 : index
    %c0_7 = arith.constant 0 : index
    %8 = vector.load %arg6[%c0_6, %c0_7] : memref<16x256xf32, #tpu.memory_space<vmem>>, vector<16x256xf32>
    tpu.vector_store %arg6[%c0_6, %c0_7], %7 {strides = array<i32>} : memref<16x256xf32, #tpu.memory_space<vmem>>, vector<16x256xf32>,
    %c0_i32_8 = arith.constant 0 : i32
    %9 = arith.cmpi eq, %arg2, %c0_i32_8 : i32
    %10 = arith.extui %9 : i1 to i32
    %c0_i32_9 = arith.constant 0 : i32
    %11 = arith.cmpi ne, %10, %c0_i32_9 : i32
    scf.if %11 {
      %c0_10 = arith.constant 0 : index
      %c0_11 = arith.constant 0 : index
      %12 = vector.load %arg6[%c0_10, %c0_11] : memref<16x256xf32, #tpu.memory_space<vmem>>, vector<16x256xf32>
      %c0_12 = arith.constant 0 : index
      %c0_13 = arith.constant 0 : index
      %13 = vector.load %arg5[%c0_12, %c0_13] : memref<16x256xf32, #tpu.memory_space<vmem>>, vector<16x256xf32>
      tpu.vector_store %arg5[%c0_12, %c0_13], %12 {strides = array<i32>} : memref<16x256xf32, #tpu.memory_space<vmem>>, vector<16x256xf32>,
    } else {
    }
    return
  }
  func.func @transform_0(%arg0: i32, %arg1: i32, %arg2: i32) -> (i32, i32) {
    %c0_i32 = arith.constant 0 : i32
    return %arg0, %arg2 : i32, i32
  }
  func.func @transform_1(%arg0: i32, %arg1: i32, %arg2: i32) -> (i32, i32) {
    %c0_i32 = arith.constant 0 : i32
    return %arg2, %arg1 : i32, i32
  }
  func.func @transform_2(%arg0: i32, %arg1: i32, %arg2: i32) -> (i32, i32) {
    %c0_i32 = arith.constant 0 : i32
    return %arg0, %arg1 : i32, i32
  }
}

</mosaic_0001>

<bundles_post_ra>
// kernel: gpt_forward.16
= control target key start
LH: loop header
LB: loop body
LE: loop exit
PB: predicated region body
PF: predicated region fallthrough
CT: control target
= control target key end

     0   :  { %vm17_vm0 = vcmask 261120   ;;  %vm50_vm1 = vcmask 257024   ;;  %s97_s0 = inlined_call_operand.vmem [shape: bf16[16,32], index: 0, kind: input, shape index: {}]   ;;  %s98_s1 = inlined_call_operand.vmem [shape: f32[1,32], index: 1, kind: input, shape index: {}]   ;;  %s99_s2 = inlined_call_operand.vmem [shape: bf16[16,32], index: 2, kind: output, shape index: {}]  }
   0x1   :  { %v63_v0 = vld [vmem:[%s97_s0] sm:$0xff]  }
   0x2   :  { %v64_v1 = vunpack.c.l.bf16 %v63_v0  ;;  %v65_v2 = vunpack.c.h.bf16 %v63_v0  ;;  %v57_v14 = vld [vmem:[%s98_s1] ss:$0 sm:$0xff] }
   0x4   :  { %v15_v3 = vmul.f32 %v64_v1, %v64_v1  ;;  %v16_v4 = vmul.f32 %v65_v2, %v65_v2 }
   0x6   :  { %v18_v5 = vsel %vm17_vm0, %v15_v3, 0.0  ;;  %v21_v6 = vsel %vm17_vm0, %v16_v4, 0.0 }
   0x7   :  { %19 = vadd.xlane.f32.xlu0 %v18_v5 }
   0xb   :  { %22 = vadd.xlane.f32.xlu0 %v21_v6 }
  0x94   :  { %v20_v7 = vpop.xlane.xlu0 %19 }
  0x95   :  { %v25_v8 = vmul.f32 0.03125, %v20_v7 }
  0x97   :  { %v27_v9 = vadd.f32 1e-08, %v25_v8 }
  0x98   :  { %v23_v10 = vpop.xlane.xlu0 %22 }
  0x99   :  { %66 = vrsqrt.f32 %v27_v9  ;;  %v26_v11 = vmul.f32 0.03125, %v23_v10 }
  0x9b   :  { %v28_v12 = vadd.f32 1e-08, %v26_v11 }
  0x9d   :  { %68 = vrsqrt.f32 %v28_v12 }
  0xa3   :  { %v67_v13 = vpop.eup %66 }
  0xa4   :  { %v31_v15 = vmul.f32 %v67_v13, %v64_v1 }
  0xa6   :  { %v40_v16 = vmul.f32 %v57_v14, %v31_v15 }
  0xa7   :  { %v69_v17 = vpop.eup %68 }
  0xa8   :  { %v60_v18 = vpack.c.bf16 %v40_v16, %v40_v16  ;;  %v32_v19 = vmul.f32 %v69_v17, %v65_v2 }
  0xaa   :  { %51 = vst.msk [vmem:[%s99_s2] sm:$0xf] %vm50_vm1, %v60_v18  ;;  %v41_v20 = vmul.f32 %v57_v14, %v32_v19 }
  0xac   :  { %v61_v21 = vpack.c.bf16 %v41_v20, %v41_v20 }
  0xae   :  { %52 = vst.msk [vmem:[%s99_s2 + $0x4] sm:$0xf] %vm50_vm1, %v61_v21 }

// kernel: gpt_forward.17
= control target key start
LH: loop header
LB: loop body
LE: loop exit
PB: predicated region body
PF: predicated region fallthrough
CT: control target
= control target key end

     0   :  { %vm16_vm0 = vcmask 785408   ;;  %v138_v0 = vmov 0.0   ;;  %vm139_vm1 = vmmov 0   ;;  %vm44_vm2 = vcmask 261120   ;;  %s174_s1 = inlined_call_operand.vmem [shape: bf16[32,96], index: 1, kind: input, shape index: {}]   ;;  %s175_s0 = inlined_call_operand.vmem [shape: bf16[16,32], index: 0, kind: input, shape index: {}]   ;;  %s176_s2 = inlined_call_operand.vmem [shape: bf16[16,96], index: 2, kind: output, shape index: {}]  }
   0x1   :  { %125 = vmatprep.subr.bf16.mxu0 %v138_v0  ;;  %v135_v1 = vld [vmem:[%s174_s1] sm:$0xff]   ;;  %129 = vmatprep.mubr.msk.bf16.mxu0 %vm139_vm1, %v138_v0  ;;  %17 = vst.msk [vmem:[#allocation2] sm:$0xff] %vm16_vm0, %v138_v0  ;;  %18 = vst.msk [vmem:[#allocation2 + $0x8] sm:$0xff] %vm16_vm0, %v138_v0  ;;  %v136_v2 = vld [vmem:[%s174_s1 + $0x8] sm:$0xff]   ;;  %vm107_vm3 = vcmask 781312  }
   0x2   :  { %126 = vmatpush3.bf16.msra.mxu0 %v135_v1  ;;  %v137_v3 = vld [vmem:[%s175_s0] sm:$0xff]  }
   0x3   :  { %127 = vmatprep.subr.bf16.mxu0 %v138_v0 }
   0x6   :  { %128 = vmatpush3.bf16.msra.mxu0 %v136_v2 }
   0x8   :  { %v19_v4 = vld [vmem:[#allocation2] sm:$0xff]  ;;  %v20_v6 = vld [vmem:[#allocation2 + $0x8] sm:$0xff] }
   0x9   :  { %130 = vmatmul.mubr.msk.bf16.vlgmr.msra.gmra.mrb[0].mxu0 %vm44_vm2, %v137_v3 }
  0xdc   :  { %v82_v5 = vpop.f32.mrb[0].mxu0 }
  0xdd   :  { %v89_v7 = vadd.f32 %v82_v5, %v19_v4  ;;  %v131_v8 = vpop.f32.mrb[1].mxu0 }
  0xde   :  { %v85_v9 = vpop.f32.mrb[2].mxu0 }
  0xdf   :  { %92 = vst.msk [vmem:[#allocation2] sm:$0xff] %vm16_vm0, %v89_v7  ;;  %v90_v10 = vadd.f32 %v85_v9, %v20_v6  ;;  %v132_v11 = vpop.f32.mrb[3].mxu0 }
  0xe1   :  { %93 = vst.msk [vmem:[#allocation2 + $0x8] sm:$0xff] %vm16_vm0, %v90_v10 }
  0xe6   :  { %v97_v12 = vld [vmem:[#allocation2] sm:$0xff] }
  0xe7   :  { %v120_v13 = vpack.c.bf16 %v97_v12, %v97_v12 }
  0xe8   :  { %v98_v14 = vld [vmem:[#allocation2 + $0x8] sm:$0xff] }
  0xe9   :  { %108 = vst.msk [vmem:[%s176_s2] sm:$0xf] %vm107_vm3, %v120_v13  ;;  %v121_v15 = vpack.c.bf16 %v98_v14, %v98_v14 }
  0xeb   :  { %109 = vst.msk [vmem:[%s176_s2 + $0x4] sm:$0xf] %vm107_vm3, %v121_v15 }

// kernel: gpt_forward.18
= control target key start
LH: loop header
LB: loop body
LE: loop exit
PB: predicated region body
PF: predicated region fallthrough
CT: control target
= control target key end

     0   :  { %s682_s12 = smov 0   ;;  %s684_s13 = smov 0   ;;  %s738_s0 = inlined_call_operand.vmem [shape: bf16[8,8,8], index: 0, kind: input, shape index: {}]   ;;  %s739_s1 = inlined_call_operand.vmem [shape: bf16[8,8,8], index: 1, kind: input, shape index: {}]   ;;  %s740_s2 = inlined_call_operand.vmem [shape: bf16[8,8,8], index: 2, kind: input, shape index: {}]   ;;  %s741_s3 = inlined_call_operand.vmem [shape: bf16[8,8,8], index: 3, kind: output, shape index: {}]  }
   0x1   :  { %s686_s14 = smov 0  }
   0x2 LB: > { %s32_s15 = sadd.s32 1, %s652_s13  ;;  %p573_p0 = scmp.ge.s32.totalorder %s656_s14, 1  ;;  %s656_s14 = sphi %s686_s14, %s13_s14   ;;  %s652_s13 = sphi %s684_s13, %s743_s13   ;;  %s648_s12 = sphi %s682_s12, %s742_s12  }
   0x3   : > { %p34_p1 = scmp.ge.s32.totalorder %s32_s15, 8  ;;  %p206_p2 = scmp.lt.s32.totalorder %s656_s14, 9 }
   0x5   : > { %s745_s15 = smov (%p34_p1, %s32_s15), 0  ;;  %p207_p3 = pnand %p573_p0, %p206_p2 }
   0x6   : > { %p252_p4 = scmp.lt.s32.totalorder (!%p207_p3), %s648_s12, 7  ;;  %vm296_vm0 = vcmask (!%p207_p3), 64512   ;;  %v658_v0 = vmov (!%p207_p3), 0.0   ;;  %vm659_vm1 = vmmov (!%p207_p3), 0   ;;  %vm293_vm2 = vcmask (!%p207_p3), 7168  }
   0x7   : > { %210 = sbr.rel (%p207_p3) target bundleno = 826 (0x33a), region = 32  ;;  %586 = vmatprep.subr.bf16.mxu0 (!%p207_p3), %v658_v0  ;;  %297 = vst.msk [vmem:[#allocation4] sm:$0xff] (!%p207_p3), %vm296_vm0, %v658_v0  ;;  %588 = vmatprep.mubr.msk.bf16.mxu0 (!%p207_p3), %vm659_vm1, %v658_v0  ;;  %v660_v4 = vmov (!%p207_p3), -inf   ;;  %v353_v5 = vlaneseq (!%p207_p3)  ;;  %v661_v15 = vmov (!%p207_p3), 0   ;;  %vm400_vm4 = vcmask (!%p207_p3), 1043456  }
   0x8   : > { %592 = vmatprep.subr.bf16.mxu1 (!%p207_p3), %v658_v0  ;;  %594 = vmatprep.mubr.msk.bf16.mxu1 (!%p207_p3), %vm659_vm1, %v658_v0  ;;  %294 = vst.msk [vmem:[#allocation2] sm:$0xff] (!%p207_p3), %vm293_vm2, %v660_v4  ;;  %295 = vst.msk [vmem:[#allocation3] sm:$0xff] (!%p207_p3), %vm293_vm2, %v658_v0  ;;  %vm460_vm5 = vcmask (!%p207_p3), 60416  }
   0x9   : > { %v354_v6 = vshrl.u32 (!%p207_p3), %v353_v5, 7  ;;  %v359_v7 = vand.u32 (!%p207_p3), 127, %v353_v5  ;;  %626 = vset.pattern.permute.xlu0 (!%p207_p3), %v661_v15  ;;  %627 = vset.pattern.permute.xlu1 (!%p207_p3), %v661_v15 }
   0xb   : > { %vm362_vm3 = vcmp.le.s32.totalorder (!%p207_p3), %v359_v7, %v354_v6 }
   0xe   : > { %s747_s12 = smov (!%p252_p4, %s648_s12), 7  ;;  %v388_v36 = vld [vmem:[#allocation4] sm:$0xff] }
   0xf   : > { %s701_s16 = sshll.u32 %s747_s12, 2  ;;  %v364_v16 = vld [vmem:[#allocation2] sm:$0xff]  ;;  %v380_v30 = vld [vmem:[#allocation3] sm:$0xff] }
  0x10   : > { %s267_s19 = scalar_lea.vmem %s739_s1, %s701_s16  ;;  %s258_s22 = scalar_lea.vmem %s738_s0, %s701_s16 }
  0x11   : > { %v303_v1 = vld [vmem:[%s267_s19] sm:$0xf]  ;;  %s278_s25 = scalar_lea.vmem %s740_s2, %s701_s16  ;;  %s287_s28 = scalar_lea.vmem %s741_s3, %s701_s16 }
  0x12   : > { %v309_v2 = vsel %vm296_vm0, %v303_v1, 0  ;;  %v302_v3 = vld [vmem:[%s258_s22] sm:$0xf] }
  0x13   : > { %587 = vmatpush3.bf16.xpose.msra.mxu0 %v309_v2  ;;  %v396_v20 = vld [vmem:[%s278_s25] sm:$0xf] }
  0x14   : > { %v402_v21 = vsel %vm400_vm4, %v396_v20, 0 }
  0x15   : > { %593 = vmatpush3.bf16.msra.mxu1 %v402_v21 }
  0x1a   : > { %589 = vmatmul.mubr.msk.bf16.vlgmr.msra.gmra.mrb[0].mxu0 %vm296_vm0, %v302_v3 }
  0xed   : > { %v345_v8 = vpop.f32.mrb[0].mxu0 }
  0xee   : > { %v351_v9 = vmul.f32 0.35355338, %v345_v8  ;;  %v590_v10 = vpop.f32.mrb[1].mxu0 }
  0xef   : > { %v348_v11 = vpop.f32.mrb[2].mxu0 }
  0xf0   : > { %v591_v12 = vpop.f32.mrb[3].mxu0  ;;  %v363_v13 = vsel %vm362_vm3, %v351_v9, -1e+30 }
  0xf1   : > { %v365_v14 = vsel %vm296_vm0, %v363_v13, -inf }
  0xf2   : > { %366 = vmax.xlane.f32.xlu0 %v365_v14 }
 0x17f   : > { %v367_v17 = vpop.xlane.xlu0 %366 }
 0x180   : > { %v368_v18 = vmax.f32 %v364_v16, %v367_v17 }
 0x182   : > { %v369_v19 = vsub.f32 %v364_v16, %v368_v18  ;;  %446 = vst.msk [vmem:[#allocation2] sm:$0xff] %vm293_vm2, %v368_v18  ;;  %374 = vperm.xlu0 %626, %v368_v18  }
 0x184   : > { %v370_v28 = vmul.f32 1.442695, %v369_v19 }
 0x201   : > { %v375_v22 = vpop.permute.xlu0 %374 }
 0x202   : > { %v377_v23 = vsub.f32 %v363_v13, %v375_v22 }
 0x204   : > { %v378_v24 = vmul.f32 1.442695, %v377_v23 }
 0x206   : > { %628 = vpow2.f32 %v378_v24 }
 0x207   : > { %630 = vpow2.f32 %v370_v28 }
 0x210   : > { %v629_v25 = vpop.eup %628 }
 0x211   : > { %v382_v26 = vsel %vm296_vm0, %v629_v25, 0.0  ;;  %v395_v27 = vpack.c.bf16 %v629_v25, %v629_v25  ;;  %v631_v29 = vpop.eup %630 }
 0x212   : > { %383 = vadd.xlane.f32.xlu1 %v382_v26  ;;  %v381_v31 = vmul.f32 %v631_v29, %v380_v30 }
 0x213   : > { %595 = vmatmul.mubr.msk.bf16.vlgmr.msra.gmra.mrb[0].mxu1 %vm296_vm0, %v395_v27 }
 0x223   : > { %391 = vperm.xlu1 %627, %v631_v29  }
 0x29f   : > { %v384_v32 = vpop.xlane.xlu1 %383 }
 0x2a0   : > { %v385_v33 = vadd.f32 %v384_v32, %v381_v31 }
 0x2a2   : > { %387 = vst.msk [vmem:[#allocation3] sm:$0xff] %vm293_vm2, %v385_v33 }
 0x2a3   : > { %v392_v37 = vpop.permute.xlu1 %391 }
 0x2a4   : > { %v394_v38 = vmul.f32 %v392_v37, %v388_v36 }
 0x2a9   : > { %v450_v34 = vld [vmem:[#allocation3] sm:$0xff] }
 0x2aa   : > { %632 = vrcp.f32 %v450_v34 }
 0x2b4   : > { %v633_v35 = vpop.eup %632 }
 0x2b5   : > { %455 = vperm.xlu1 %627, %v633_v35  }
 0x2e6   : > { %v438_v39 = vpop.f32.mrb[0].mxu1 }
 0x2e7   : > { %v444_v40 = vadd.f32 %v438_v39, %v394_v38  ;;  %v596_v41 = vpop.f32.mrb[1].mxu1 }
 0x2e8   : > { %v441_v42 = vpop.f32.mrb[2].mxu1 }
 0x2e9   : > { %445 = vst.msk [vmem:[#allocation4] sm:$0xff] %vm296_vm0, %v444_v40  ;;  %v597_v43 = vpop.f32.mrb[3].mxu1 }
 0x2f0   : > { %v452_v44 = vld [vmem:[#allocation4] sm:$0xff] }
 0x334   : > { %v456_v45 = vpop.permute.xlu1 %455 }
 0x335   : > { %v458_v46 = vmul.f32 %v456_v45, %v452_v44 }
 0x337   : > { %v459_v47 = vpack.c.bf16 %v458_v46, %v458_v46 }
 0x339   : > { %461 = vst.msk [vmem:[%s287_s28] sm:$0xf] %vm460_vm5, %v459_v47 }
 0x33a PF: > { %s13_s14 = sadd.s32 1, %s656_s14   ;;  %s742_s12 = smov %s652_s13 }
 0x33b   : > { %p10_p5 = scmp.ge.s32.totalorder %s13_s14, 10   ;;  %s743_s13 = smov %s745_s15 }
 0x33d   :  { %12 = sbr.rel (!%p10_p5) target bundleno = 2 (0x2), region = 80 }

// kernel: gpt_forward.19
= control target key start
LH: loop header
LB: loop body
LE: loop exit
PB: predicated region body
PF: predicated region fallthrough
CT: control target
= control target key end

     0   :  { %vm19_vm0 = vcmask 261120   ;;  %v150_v0 = vmov 0.0   ;;  %vm151_vm1 = vmmov 0   ;;  %vm115_vm2 = vcmask 257024   ;;  %s195_s1 = inlined_call_operand.vmem [shape: bf16[32,32], index: 1, kind: input, shape index: {}]   ;;  %s196_s0 = inlined_call_operand.vmem [shape: bf16[16,32], index: 0, kind: input, shape index: {}]   ;;  %s197_s2 = inlined_call_operand.vmem [shape: bf16[16,32], index: 2, kind: input, shape index: {}]   ;;  %s198_s3 = inlined_call_operand.vmem [shape: bf16[16,32], index: 3, kind: output, shape index: {}]  }
   0x1   :  { %137 = vmatprep.subr.bf16.mxu0 %v150_v0  ;;  %v147_v1 = vld [vmem:[%s195_s1] sm:$0xff]   ;;  %141 = vmatprep.mubr.msk.bf16.mxu0 %vm151_vm1, %v150_v0  ;;  %20 = vst.msk [vmem:[#allocation2] sm:$0xff] %vm19_vm0, %v150_v0  ;;  %21 = vst.msk [vmem:[#allocation2 + $0x8] sm:$0xff] %vm19_vm0, %v150_v0  ;;  %v148_v2 = vld [vmem:[%s195_s1 + $0x8] sm:$0xff]  }
   0x2   :  { %138 = vmatpush3.bf16.msra.mxu0 %v147_v1  ;;  %v149_v3 = vld [vmem:[%s196_s0] sm:$0xff]  }
   0x3   :  { %139 = vmatprep.subr.bf16.mxu0 %v150_v0  ;;  %v131_v12 = vld [vmem:[%s197_s2] sm:$0xff]  }
   0x4   :  { %v132_v13 = vunpack.c.l.bf16 %v131_v12  ;;  %v133_v14 = vunpack.c.h.bf16 %v131_v12 }
   0x6   :  { %140 = vmatpush3.bf16.msra.mxu0 %v148_v2 }
   0x8   :  { %v22_v4 = vld [vmem:[#allocation2] sm:$0xff]  ;;  %v23_v6 = vld [vmem:[#allocation2 + $0x8] sm:$0xff] }
   0x9   :  { %142 = vmatmul.mubr.msk.bf16.vlgmr.msra.gmra.mrb[0].mxu0 %vm19_vm0, %v149_v3 }
  0xdc   :  { %v85_v5 = vpop.f32.mrb[0].mxu0 }
  0xdd   :  { %v92_v7 = vadd.f32 %v85_v5, %v22_v4  ;;  %v143_v8 = vpop.f32.mrb[1].mxu0 }
  0xde   :  { %v88_v9 = vpop.f32.mrb[2].mxu0 }
  0xdf   :  { %94 = vst.msk [vmem:[#allocation2] sm:$0xff] %vm19_vm0, %v92_v7  ;;  %v93_v10 = vadd.f32 %v88_v9, %v23_v6  ;;  %v144_v11 = vpop.f32.mrb[3].mxu0 }
  0xe1   :  { %95 = vst.msk [vmem:[#allocation2 + $0x8] sm:$0xff] %vm19_vm0, %v93_v10 }
  0xe6   :  { %v99_v15 = vld [vmem:[#allocation2] sm:$0xff] }
  0xe7   :  { %v105_v16 = vadd.f32 %v132_v13, %v99_v15 }
  0xe8   :  { %v100_v17 = vld [vmem:[#allocation2 + $0x8] sm:$0xff] }
  0xe9   :  { %v128_v18 = vpack.c.bf16 %v105_v16, %v105_v16  ;;  %v106_v19 = vadd.f32 %v133_v14, %v100_v17 }
  0xeb   :  { %116 = vst.msk [vmem:[%s198_s3] sm:$0xf] %vm115_vm2, %v128_v18  ;;  %v129_v20 = vpack.c.bf16 %v106_v19, %v106_v19 }
  0xed   :  { %117 = vst.msk [vmem:[%s198_s3 + $0x4] sm:$0xf] %vm115_vm2, %v129_v20 }

// kernel: gpt_forward.21
= control target key start
LH: loop header
LB: loop body
LE: loop exit
PB: predicated region body
PF: predicated region fallthrough
CT: control target
= control target key end

     0   :  { %v264_v0 = vmov 0.0   ;;  %vm265_vm0 = vmmov 0   ;;  %vm48_vm1 = vcmask 261120   ;;  %s307_s1 = inlined_call_operand.vmem [shape: bf16[32,128], index: 1, kind: input, shape index: {}]   ;;  %s308_s2 = inlined_call_operand.vmem [shape: bf16[32,128], index: 2, kind: input, shape index: {}]   ;;  %s309_s0 = inlined_call_operand.vmem [shape: bf16[16,32], index: 0, kind: input, shape index: {}]   ;;  %s310_s3 = inlined_call_operand.vmem [shape: bf16[16,128], index: 3, kind: output, shape index: {}]  }
   0x1   :  { %232 = vmatprep.subr.bf16.mxu0 %v264_v0  ;;  %v250_v1 = vld [vmem:[%s307_s1] sm:$0xff]   ;;  %236 = vmatprep.mubr.msk.bf16.mxu0 %vm265_vm0, %v264_v0  ;;  %v251_v2 = vld [vmem:[%s307_s1 + $0x8] sm:$0xff]  }
   0x2   :  { %240 = vmatprep.subr.bf16.mxu1 %v264_v0  ;;  %244 = vmatprep.mubr.msk.bf16.mxu1 %vm265_vm0, %v264_v0  ;;  %v253_v3 = vld [vmem:[%s308_s2] sm:$0xff]   ;;  %v254_v5 = vld [vmem:[%s308_s2 + $0x8] sm:$0xff]  }
   0x3   :  { %233 = vmatpush3.bf16.msra.mxu0 %v250_v1  ;;  %v252_v4 = vld [vmem:[%s309_s0] sm:$0xff]   ;;  %241 = vmatpush3.bf16.msra.mxu1 %v253_v3 }
   0x4   :  { %234 = vmatprep.subr.bf16.mxu0 %v264_v0  ;;  %242 = vmatprep.subr.bf16.mxu1 %v264_v0  ;;  %v255_v6 = vld [vmem:[%s309_s0] sm:$0xff]  }
   0x7   :  { %235 = vmatpush3.bf16.msra.mxu0 %v251_v2  ;;  %243 = vmatpush3.bf16.msra.mxu1 %v254_v5 }
   0xa   :  { %237 = vmatmul.mubr.msk.bf16.vlgmr.msra.gmra.mrb[0].mxu0 %vm48_vm1, %v252_v4  ;;  %245 = vmatmul.mubr.msk.bf16.vlgmr.msra.gmra.mrb[0].mxu1 %vm48_vm1, %v255_v6 }
  0xdd   :  { %v86_v7 = vpop.f32.mrb[0].mxu0  ;;  %v159_v13 = vpop.f32.mrb[0].mxu1 }
  0xde   :  { %v215_v8 = vmul.f32 -1.442695, %v86_v7  ;;  %v238_v9 = vpop.f32.mrb[1].mxu0  ;;  %v246_v14 = vpop.f32.mrb[1].mxu1 }
  0xdf   :  { %v89_v10 = vpop.f32.mrb[2].mxu0  ;;  %v162_v15 = vpop.f32.mrb[2].mxu1 }
  0xe0   :  { %256 = vpow2.f32 %v215_v8  ;;  %v216_v11 = vmul.f32 -1.442695, %v89_v10  ;;  %v239_v12 = vpop.f32.mrb[3].mxu0  ;;  %v247_v16 = vpop.f32.mrb[3].mxu1 }
  0xe2   :  { %258 = vpow2.f32 %v216_v11 }
  0xea   :  { %v257_v17 = vpop.eup %256 }
  0xeb   :  { %v181_v18 = vadd.f32 1.0, %v257_v17 }
  0xec   :  { %v259_v19 = vpop.eup %258 }
  0xed   :  { %260 = vrcp.f32 %v181_v18  ;;  %v182_v20 = vadd.f32 1.0, %v259_v19 }
  0xef   :  { %262 = vrcp.f32 %v182_v20 }
  0xf7   :  { %v261_v21 = vpop.eup %260 }
  0xf8   :  { %v187_v22 = vmul.f32 %v261_v21, %v86_v7 }
  0xf9   :  { %v263_v23 = vpop.eup %262 }
  0xfa   :  { %v188_v24 = vmul.f32 %v263_v23, %v89_v10  ;;  %v191_v25 = vmul.f32 %v187_v22, %v159_v13 }
  0xfc   :  { %v192_v26 = vmul.f32 %v188_v24, %v162_v15 }
  0xfe   :  { %v224_v27 = vpack.c.bf16 %v192_v26, %v191_v25 }
 0x100   :  { %225 = vst [vmem:[%s310_s3] sm:$0xff] %v224_v27  }

// kernel: gpt_forward.22
= control target key start
LH: loop header
LB: loop body
LE: loop exit
PB: predicated region body
PF: predicated region fallthrough
CT: control target
= control target key end

     0   :  { %vm19_vm0 = vcmask 261120   ;;  %v225_v0 = vmov 0.0   ;;  %vm226_vm1 = vmmov 0   ;;  %vm161_vm2 = vcmask 257024   ;;  %s287_s1 = inlined_call_operand.vmem [shape: bf16[128,32], index: 1, kind: input, shape index: {}]   ;;  %s288_s0 = inlined_call_operand.vmem [shape: bf16[16,128], index: 0, kind: input, shape index: {}]   ;;  %s289_s2 = inlined_call_operand.vmem [shape: bf16[16,32], index: 2, kind: input, shape index: {}]   ;;  %s290_s3 = inlined_call_operand.vmem [shape: bf16[16,32], index: 3, kind: output, shape index: {}]  }
   0x1   :  { %194 = vmatprep.subr.bf16.mxu0 %v225_v0  ;;  %v216_v1 = vld [vmem:[%s287_s1] sm:$0xff]   ;;  %210 = vmatprep.mubr.msk.bf16.mxu0 %vm226_vm1, %v225_v0  ;;  %20 = vst.msk [vmem:[#allocation2] sm:$0xff] %vm19_vm0, %v225_v0  ;;  %21 = vst.msk [vmem:[#allocation2 + $0x8] sm:$0xff] %vm19_vm0, %v225_v0  ;;  %v217_v2 = vld [vmem:[%s287_s1 + $0x8] sm:$0xff]  }
   0x2   :  { %195 = vmatpush3.bf16.msra.mxu0 %v216_v1  ;;  %v218_v3 = vld [vmem:[%s287_s1 + $0x10] sm:$0xff]   ;;  %v219_v4 = vld [vmem:[%s287_s1 + $0x18] sm:$0xff]   ;;  %v220_v5 = vld [vmem:[%s287_s1 + $0x20] sm:$0xff]  }
   0x3   :  { %196 = vmatprep.subr.bf16.mxu0 %v225_v0  ;;  %v221_v6 = vld [vmem:[%s287_s1 + $0x28] sm:$0xff]   ;;  %v222_v7 = vld [vmem:[%s287_s1 + $0x30] sm:$0xff]   ;;  %v223_v8 = vld [vmem:[%s287_s1 + $0x38] sm:$0xff]  }
   0x4   :  { %v224_v9 = vld [vmem:[%s288_s0] sm:$0xff]  }
   0x5   :  { %v182_v18 = vld [vmem:[%s289_s2] sm:$0xff]  }
   0x6   :  { %197 = vmatpush3.bf16.msra.mxu0 %v217_v2  ;;  %v183_v19 = vunpack.c.l.bf16 %v182_v18  ;;  %v184_v20 = vunpack.c.h.bf16 %v182_v18 }
   0x7   :  { %198 = vmatprep.subr.bf16.mxu0 %v225_v0 }
   0x8   :  { %v22_v10 = vld [vmem:[#allocation2] sm:$0xff]  ;;  %v23_v12 = vld [vmem:[#allocation2 + $0x8] sm:$0xff] }
   0xa   :  { %199 = vmatpush3.bf16.msra.mxu0 %v218_v3 }
   0xb   :  { %200 = vmatprep.subr.bf16.mxu0 %v225_v0 }
   0xe   :  { %201 = vmatpush3.bf16.msra.mxu0 %v219_v4 }
   0xf   :  { %202 = vmatprep.subr.bf16.mxu0 %v225_v0 }
  0x12   :  { %203 = vmatpush3.bf16.msra.mxu0 %v220_v5 }
  0x13   :  { %204 = vmatprep.subr.bf16.mxu0 %v225_v0 }
  0x16   :  { %205 = vmatpush3.bf16.msra.mxu0 %v221_v6 }
  0x17   :  { %206 = vmatprep.subr.bf16.mxu0 %v225_v0 }
  0x1a   :  { %207 = vmatpush3.bf16.msra.mxu0 %v222_v7 }
  0x1b   :  { %208 = vmatprep.subr.bf16.mxu0 %v225_v0 }
  0x1e   :  { %209 = vmatpush3.bf16.msra.mxu0 %v223_v8 }
  0x21   :  { %211 = vmatmul.mubr.bf16.vlgmr.msra.gmra.mrb[0].mxu0 %v224_v9 }
  0xf4   :  { %v130_v11 = vpop.f32.mrb[0].mxu0 }
  0xf5   :  { %v137_v13 = vadd.f32 %v130_v11, %v22_v10  ;;  %v212_v14 = vpop.f32.mrb[1].mxu0 }
  0xf6   :  { %v133_v15 = vpop.f32.mrb[2].mxu0 }
  0xf7   :  { %140 = vst.msk [vmem:[#allocation2] sm:$0xff] %vm19_vm0, %v137_v13  ;;  %v138_v16 = vadd.f32 %v133_v15, %v23_v12  ;;  %v213_v17 = vpop.f32.mrb[3].mxu0 }
  0xf9   :  { %141 = vst.msk [vmem:[#allocation2 + $0x8] sm:$0xff] %vm19_vm0, %v138_v16 }
  0xfe   :  { %v145_v21 = vld [vmem:[#allocation2] sm:$0xff] }
  0xff   :  { %v151_v22 = vadd.f32 %v183_v19, %v145_v21 }
 0x100   :  { %v146_v23 = vld [vmem:[#allocation2 + $0x8] sm:$0xff] }
 0x101   :  { %v179_v24 = vpack.c.bf16 %v151_v22, %v151_v22  ;;  %v152_v25 = vadd.f32 %v184_v20, %v146_v23 }
 0x103   :  { %162 = vst.msk [vmem:[%s290_s3] sm:$0xf] %vm161_vm2, %v179_v24  ;;  %v180_v26 = vpack.c.bf16 %v152_v25, %v152_v25 }
 0x105   :  { %163 = vst.msk [vmem:[%s290_s3 + $0x4] sm:$0xf] %vm161_vm2, %v180_v26 }

// kernel: gpt_forward.31
= control target key start
LH: loop header
LB: loop body
LE: loop exit
PB: predicated region body
PF: predicated region fallthrough
CT: control target
= control target key end

     0   :  { %v179_v2 = vmov 0   ;;  %s225_s0 = inlined_call_operand.vmem [shape: bf16[16,32], index: 0, kind: input, shape index: {}]   ;;  %s226_s1 = inlined_call_operand.vmem [shape: bf16[32,256], index: 1, kind: input, shape index: {}]   ;;  %s227_s2 = inlined_call_operand.hbm [shape: f32[16,256], index: 2, kind: output, shape index: {}]  }
   0x1   :  { %v148_v0 = vld [vmem:[%s226_s1 + $0x4] ss:$8 sps:$4 sm:$0xff]   ;;  %v150_v1 = vld [vmem:[%s226_s1] ss:$8 sps:$4 sm:$0xff]   ;;  %92 = vmatprep.mubr.bf16.mxu0 %v179_v2  ;;  %v151_v3 = vld [vmem:[%s226_s1 + $0x14] ss:$8 sps:$4 sm:$0xff]  }
   0x2   :  { %60 = vmatprep.subr.bf16.mxu0 %v148_v0  ;;  %v153_v4 = vld [vmem:[%s226_s1 + $0x10] ss:$8 sps:$4 sm:$0xff]  }
   0x3   :  { %61 = vmatpush1.bf16.msra.mxu0 %v150_v1 }
   0x4   :  { %7 = vsyncpa [#allocation4], 0  ;;  %62 = vmatprep.subr.bf16.mxu0 %v151_v3  ;;  %v154_v5 = vld [vmem:[%s225_s0] sm:$0xff]   ;;  %vm56_vm0 = vcmask 261120   ;;  %s180_s19 = smov [#allocation3]  }
   0x5   :  { %s127_s20 = sshll.u32 %s180_s19, 4  ;;  %s128_s20 = int_to_ptr.vmem [resolvable:$true] %s127_s20 }
   0x6   :  { %s155_s1 = scalar_lea.vmem %s128_s20, 512  ;;  %p160_p1 = scmp.lt.s32.totalorder %s128_s20, %s128_s20 }
   0x7   :  { %63 = vmatpush1.bf16.msra.mxu0 %v153_v4  ;;  %p156_p0 = scmp.ne.s32.totalorder %s128_s20, %s155_s1  ;;  %p161_p2 = scmp.lt.s32.totalorder %s155_s1, %s155_s1 }
   0x9   :  { %p162_p3 = por %p161_p2, %p160_p1 }
   0xa   :  { %143 = vmatmul.mubr.msk.bf16.vlgmr.msra.gmra.mrb[0].mxu0 %vm56_vm0, %v154_v5 }
   0xb   :  { %p163_p4 = pnand %p162_p3, %p156_p0 }
  0xdd   :  { %v94_v6 = vpop.f32.mrb[0].mxu0 }
  0xde   :  { %118 = vst [vmem:[#allocation3] sm:$0xff] %v94_v6  ;;  %v96_v7 = vpop.f32.mrb[1].mxu0 }
  0xdf   :  { %119 = vst [vmem:[#allocation3 + $0x8] sm:$0xff] %v96_v7  ;;  %v98_v8 = vpop.f32.mrb[2].mxu0 }
  0xe0   :  { %120 = vst [vmem:[#allocation3 + $0x10] sm:$0xff] %v98_v8  ;;  %v100_v9 = vpop.f32.mrb[3].mxu0 }
  0xe1   :  { %121 = vst [vmem:[#allocation3 + $0x18] sm:$0xff] %v100_v9 }
  0xe2   :  { %166 = shalt.err (!%p163_p4)
}
  0xe3   :  { %s167_s22 = scalar_lea.hbm %s227_s2, 512 }
  0xe4   :  { %p168_p5 = scmp.ne.s32.totalorder %s227_s2, %s167_s22  ;;  %p171_p6 = scmp.lt.u32.totalorder %s167_s22, %s227_s2 }
  0xe6   :  { %p173_p7 = pnand %p171_p6, %p168_p5 }
  0xe8   :  { %176 = shalt.err (!%p173_p7)
}
  0xe9   :  { %s181_s27 = smov 256   ;;  %s182_s28 = smov 16  }
  0xea   :  { %133 = dma.vmem_to_hbm [thread:$0]  %s128_s20, 512, %s227_s2, [#allocation4], %s181_s27, %s181_s27, %s182_s28  }
  0xeb   :  { %177 = dma.done.wait [#allocation4], 512  }
  0xec   :  { %178 = vsyncadd [#allocation4], 4294966784 }
  0xed   :  { %137 = vsyncpa [#allocation4], 1 }

</bundles_post_ra>
